<compile_context>
chip_gen: v7x
topology: tpu7x:2x2x1
jax: 0.10.0
libtpu: 0.0.40
codegen_flags: <defaults>
</compile_context>

<pallas_src>
import jax
import jax.numpy as jnp
from jax.experimental import pallas as pl
from jax.experimental.pallas import tpu as pltpu


def _round_up(x, m):
    return (x + m - 1) // m * m


def _cdiv(a, b):
    return (a + b - 1) // b


def mapping_kernel(z_ref, w0_ref, b0_ref, wr_ref, br_ref, out_ref):
    """One grid step == one tile of batch rows, full MLP fused in VMEM.

    z_ref  : (tm, D_in)   f32   latent-code row tile
    w0_ref : (D_in, F)    bf16  first Linear weight, pre-transposed
    b0_ref : (1, F)       f32   first Linear bias
    wr_ref : (L-1, F, F)  bf16  remaining Linear weights, pre-transposed
    br_ref : (L-1, 1, F)  f32   remaining Linear biases
    out_ref: (tm, F)      f32   output tile
    """
    # bf16 operands into the MXU, f32 accumulation; bias add + ReLU stay f32.
    h = jnp.dot(z_ref[...].astype(jnp.bfloat16), w0_ref[...],
                preferred_element_type=jnp.float32) + b0_ref[...]
    n_rest = wr_ref.shape[0]
    for i in range(n_rest):                      # static unroll: L-1 MXU matmuls
        h = jnp.maximum(h, 0.0)                  # ReLU (VPU, f32)
        h = jnp.dot(h.astype(jnp.bfloat16), wr_ref[i],
                    preferred_element_type=jnp.float32) + br_ref[i]
    out_ref[...] = h.astype(out_ref.dtype)


def prepare_mapping_params(weights, biases):
    """One-time parameter preprocessing (hoisted out of the forward path).

    weights[l]: PyTorch Linear layout (out_features, in_features).
    biases[l]:  (out_features,).
    Returns MXU-ready arrays: (w0_t bf16, b0 f32, wr bf16, br f32).
    """
    F = weights[0].shape[0]
    w0_t = weights[0].T.astype(jnp.bfloat16)                             # (D_in, F)
    b0 = biases[0].reshape(1, F).astype(jnp.float32)                     # (1, F)
    wr = jnp.stack([w.T for w in weights[1:]], 0).astype(jnp.bfloat16)   # (L-1, F, F)
    br = jnp.stack([b.reshape(1, F) for b in biases[1:]], 0).astype(jnp.float32)
    return w0_t, b0, wr, br


def _select_tile(n_rows, max_block_rows):
    """Balanced sublane-dense batch tile; >=2 grid steps when N > 128 (v7x TCs)."""
    n_tiles = max(1, _cdiv(n_rows, max_block_rows))
    if n_rows > 128:
        n_tiles = max(n_tiles, 2)
    tm = _round_up(_cdiv(n_rows, n_tiles), 8)
    n_pad = _round_up(n_rows, tm)
    return tm, n_pad


def mapping_network(z, params, *, max_block_rows=512):
    """z: (N, D_in) f32; params from prepare_mapping_params(). Returns (N, F) f32.

    max_block_rows=512 amortizes the weight-stationary MXU load and the
    ~0.35 us per-grid-step overhead; can be raised to 1024 on v5e/v6e.
    """
    w0_t, b0, wr, br = params
    N, D_in = z.shape
    F = w0_t.shape[1]
    L = wr.shape[0] + 1

    tm, n_pad = _select_tile(N, max_block_rows)
    if n_pad != N:
        z = jnp.pad(z, ((0, n_pad - N), (0, 0)))

    # VMEM budget: double-buffered z/out tiles + resident bf16 weights + f32 h.
    est = (4 * 2 * tm * (D_in + F)               # in/out tiles, double-buffered
           + 2 * (D_in * F + (L - 1) * F * F)    # bf16 weights (resident)
           + 4 * L * F                           # f32 biases
           + 4 * 3 * tm * F)                     # intra-kernel activation headroom
    vmem_limit = int(min(max(2 * est, 32 << 20), 64 << 20))  # valid on v5e/v6e/v7x

    def _build(param_mode):
        def pspec(shape):
            idx = lambda i, _n=len(shape): (0,) * _n
            if param_mode is None:
                return pl.BlockSpec(shape, idx)
            return pl.BlockSpec(shape, idx, pipeline_mode=param_mode)

        return pl.pallas_call(
            mapping_kernel,
            out_shape=jax.ShapeDtypeStruct((n_pad, F), z.dtype),
            grid_spec=pltpu.PrefetchScalarGridSpec(
                num_scalar_prefetch=0,
                grid=(n_pad // tm,),
                in_specs=[
                    pl.BlockSpec((tm, D_in), lambda i: (i, 0)),   # z tile
                    pspec((D_in, F)),                             # W0^T  (bf16)
                    pspec((1, F)),                                # b0    (f32)
                    pspec((L - 1, F, F)),                         # W1..^T (bf16)
                    pspec((L - 1, 1, F)),                         # b1..   (f32)
                ],
                out_specs=pl.BlockSpec((tm, F), lambda i: (i, 0)),
            ),
            compiler_params=pltpu.CompilerParams(
                dimension_semantics=("parallel",),
                vmem_limit_bytes=vmem_limit),
        )

    try:
        # Params never change across the grid -> single-buffer them (VMEM hygiene).
        out = _build(pl.Buffered(1))(z, w0_t, b0, wr, br)
    except Exception:
        # Fallback if this jax build rejects Buffered(1) at the top-level grid.
        out = _build(None)(z, w0_t, b0, wr, br)

    return out[:N]


def mapping_reference(z, weights, biases):
    """Pure-JAX f32 reference mirroring the PyTorch MappingNetwork."""
    h = z @ weights[0].T + biases[0]
    for w, b in zip(weights[1:], biases[1:]):
        h = jnp.maximum(h, 0.0)
        h = h @ w.T + b
    return h


if __name__ == "__main__":
    # Small shapes consistent with the module: batch=2 latents, z_dim=32,
    # feature_dim=128 (multiple of 128 -> lane-dense output), 8 layers.
    N, D_IN, FEAT, LAYERS = 2, 32, 128, 8

    key = jax.random.PRNGKey(0)
    key, kz = jax.random.split(key)
    z = jax.random.normal(kz, (N, D_IN), dtype=jnp.float32)

    # Deterministic PyTorch-style Linear init: weight (out, in), bias (out,),
    # uniform(-1/sqrt(fan_in), 1/sqrt(fan_in)).
    weights, biases = [], []
    fan_in = D_IN
    for _ in range(LAYERS):
        key, kw, kb = jax.random.split(key, 3)
        bound = 1.0 / float(fan_in) ** 0.5
        weights.append(
            jax.random.uniform(kw, (FEAT, fan_in), jnp.float32, -bound, bound))
        biases.append(
            jax.random.uniform(kb, (FEAT,), jnp.float32, -bound, bound))
        fan_in = FEAT

    params = prepare_mapping_params(weights, biases)   # once, at model init
    out = mapping_network(z, params)
    out = jax.block_until_ready(out)

    ref = mapping_reference(z, weights, biases)
    assert out.shape == (N, FEAT)
    # bf16 MXU operands (f32 accumulation) -> slightly looser tolerance vs f32 ref.
    assert jnp.allclose(out, ref, atol=3e-2, rtol=3e-2), "mismatch vs reference"

    print("KERNEL_OK")
</pallas_src>

<mosaic_0001>
module attributes {stable_mosaic.version = 11 : i64} {
  func.func @mapping_kernel(%arg0: i32, %arg1: memref<8x32xf32, #tpu.memory_space<vmem>>, %arg2: memref<32x128xbf16, #tpu.memory_space<vmem>>, %arg3: memref<1x128xf32, #tpu.memory_space<vmem>>, %arg4: memref<7x128x128xbf16, #tpu.memory_space<vmem>>, %arg5: memref<7x1x128xf32, #tpu.memory_space<vmem>>, %arg6: memref<8x128xf32, #tpu.memory_space<vmem>>) attributes {dimension_semantics = [#tpu.dimension_semantics<parallel>], iteration_bounds = array<i64: 1>, scalar_prefetch = 0 : i64, scratch_operands = 0 : i64, tpu.core_type = #tpu.core_type<tc>, window_params = [{transform_indices = @transform_0, window_bounds = array<i64: 8, 32>}, {pipeline_mode = #tpu.pipeline_mode<synchronous>, transform_indices = @transform_1, window_bounds = array<i64: 32, 128>}, {pipeline_mode = #tpu.pipeline_mode<synchronous>, transform_indices = @transform_2, window_bounds = array<i64: 1, 128>}, {pipeline_mode = #tpu.pipeline_mode<synchronous>, transform_indices = @transform_3, window_bounds = array<i64: 7, 128, 128>}, {pipeline_mode = #tpu.pipeline_mode<synchronous>, transform_indices = @transform_4, window_bounds = array<i64: 7, 1, 128>}, {transform_indices = @transform_5, window_bounds = array<i64: 8, 128>}]} {
    %c0 = arith.constant 0 : index
    %c0_0 = arith.constant 0 : index
    %0 = vector.load %arg1[%c0, %c0_0] : memref<8x32xf32, #tpu.memory_space<vmem>>, vector<8x32xf32>
    %1 = arith.truncf %0 : vector<8x32xf32> to vector<8x32xbf16>
    %c0_1 = arith.constant 0 : index
    %c0_2 = arith.constant 0 : index
    %2 = vector.load %arg2[%c0_1, %c0_2] : memref<32x128xbf16, #tpu.memory_space<vmem>>, vector<32x128xbf16>
    %cst = arith.constant dense<0.000000e+00> : vector<8x128xf32>
    %3 = tpu.matmul %1, %2, %cst {dimension_numbers = #tpu.dot_dimension_numbers<[1], [0], [0], [1], [0, 0, 1, 1], [], []>} : vector<8x32xbf16>, vector<32x128xbf16>, vector<8x128xf32> -> vector<8x128xf32>
    %c0_3 = arith.constant 0 : index
    %c0_4 = arith.constant 0 : index
    %4 = vector.load %arg3[%c0_3, %c0_4] : memref<1x128xf32, #tpu.memory_space<vmem>>, vector<1x128xf32>
    %5 = vector.broadcast %4 : vector<1x128xf32> to vector<8x128xf32>
    %6 = arith.addf %3, %5 : vector<8x128xf32>
    %cst_5 = arith.constant 0.000000e+00 : f32
    %7 = vector.broadcast %cst_5 : f32 to vector<8x128xf32>
    %8 = arith.maximumf %6, %7 : vector<8x128xf32>
    %9 = arith.truncf %8 : vector<8x128xf32> to vector<8x128xbf16>
    %c0_6 = arith.constant 0 : index
    %c0_7 = arith.constant 0 : index
    %c0_8 = arith.constant 0 : index
    %10 = vector.load %arg4[%c0_6, %c0_7, %c0_8] : memref<7x128x128xbf16, #tpu.memory_space<vmem>>, vector<1x128x128xbf16>
    %11 = vector.shape_cast %10 : vector<1x128x128xbf16> to vector<128x128xbf16>
    %cst_9 = arith.constant dense<0.000000e+00> : vector<8x128xf32>
    %12 = tpu.matmul %9, %11, %cst_9 {dimension_numbers = #tpu.dot_dimension_numbers<[1], [0], [0], [1], [0, 0, 1, 1], [], []>} : vector<8x128xbf16>, vector<128x128xbf16>, vector<8x128xf32> -> vector<8x128xf32>
    %c0_10 = arith.constant 0 : index
    %c0_11 = arith.constant 0 : index
    %c0_12 = arith.constant 0 : index
    %13 = vector.load %arg5[%c0_10, %c0_11, %c0_12] : memref<7x1x128xf32, #tpu.memory_space<vmem>>, vector<1x1x128xf32>
    %14 = vector.shape_cast %13 : vector<1x1x128xf32> to vector<1x128xf32>
    %15 = vector.broadcast %14 : vector<1x128xf32> to vector<8x128xf32>
    %16 = arith.addf %12, %15 : vector<8x128xf32>
    %cst_13 = arith.constant 0.000000e+00 : f32
    %17 = vector.broadcast %cst_13 : f32 to vector<8x128xf32>
    %18 = arith.maximumf %16, %17 : vector<8x128xf32>
    %19 = arith.truncf %18 : vector<8x128xf32> to vector<8x128xbf16>
    %c1 = arith.constant 1 : index
    %c0_14 = arith.constant 0 : index
    %c0_15 = arith.constant 0 : index
    %20 = vector.load %arg4[%c1, %c0_14, %c0_15] : memref<7x128x128xbf16, #tpu.memory_space<vmem>>, vector<1x128x128xbf16>
    %21 = vector.shape_cast %20 : vector<1x128x128xbf16> to vector<128x128xbf16>
    %cst_16 = arith.constant dense<0.000000e+00> : vector<8x128xf32>
    %22 = tpu.matmul %19, %21, %cst_16 {dimension_numbers = #tpu.dot_dimension_numbers<[1], [0], [0], [1], [0, 0, 1, 1], [], []>} : vector<8x128xbf16>, vector<128x128xbf16>, vector<8x128xf32> -> vector<8x128xf32>
    %c1_17 = arith.constant 1 : index
    %c0_18 = arith.constant 0 : index
    %c0_19 = arith.constant 0 : index
    %23 = vector.load %arg5[%c1_17, %c0_18, %c0_19] : memref<7x1x128xf32, #tpu.memory_space<vmem>>, vector<1x1x128xf32>
    %24 = vector.shape_cast %23 : vector<1x1x128xf32> to vector<1x128xf32>
    %25 = vector.broadcast %24 : vector<1x128xf32> to vector<8x128xf32>
    %26 = arith.addf %22, %25 : vector<8x128xf32>
    %cst_20 = arith.constant 0.000000e+00 : f32
    %27 = vector.broadcast %cst_20 : f32 to vector<8x128xf32>
    %28 = arith.maximumf %26, %27 : vector<8x128xf32>
    %29 = arith.truncf %28 : vector<8x128xf32> to vector<8x128xbf16>
    %c2 = arith.constant 2 : index
    %c0_21 = arith.constant 0 : index
    %c0_22 = arith.constant 0 : index
    %30 = vector.load %arg4[%c2, %c0_21, %c0_22] : memref<7x128x128xbf16, #tpu.memory_space<vmem>>, vector<1x128x128xbf16>
    %31 = vector.shape_cast %30 : vector<1x128x128xbf16> to vector<128x128xbf16>
    %cst_23 = arith.constant dense<0.000000e+00> : vector<8x128xf32>
    %32 = tpu.matmul %29, %31, %cst_23 {dimension_numbers = #tpu.dot_dimension_numbers<[1], [0], [0], [1], [0, 0, 1, 1], [], []>} : vector<8x128xbf16>, vector<128x128xbf16>, vector<8x128xf32> -> vector<8x128xf32>
    %c2_24 = arith.constant 2 : index
    %c0_25 = arith.constant 0 : index
    %c0_26 = arith.constant 0 : index
    %33 = vector.load %arg5[%c2_24, %c0_25, %c0_26] : memref<7x1x128xf32, #tpu.memory_space<vmem>>, vector<1x1x128xf32>
    %34 = vector.shape_cast %33 : vector<1x1x128xf32> to vector<1x128xf32>
    %35 = vector.broadcast %34 : vector<1x128xf32> to vector<8x128xf32>
    %36 = arith.addf %32, %35 : vector<8x128xf32>
    %cst_27 = arith.constant 0.000000e+00 : f32
    %37 = vector.broadcast %cst_27 : f32 to vector<8x128xf32>
    %38 = arith.maximumf %36, %37 : vector<8x128xf32>
    %39 = arith.truncf %38 : vector<8x128xf32> to vector<8x128xbf16>
    %c3 = arith.constant 3 : index
    %c0_28 = arith.constant 0 : index
    %c0_29 = arith.constant 0 : index
    %40 = vector.load %arg4[%c3, %c0_28, %c0_29] : memref<7x128x128xbf16, #tpu.memory_space<vmem>>, vector<1x128x128xbf16>
    %41 = vector.shape_cast %40 : vector<1x128x128xbf16> to vector<128x128xbf16>
    %cst_30 = arith.constant dense<0.000000e+00> : vector<8x128xf32>
    %42 = tpu.matmul %39, %41, %cst_30 {dimension_numbers = #tpu.dot_dimension_numbers<[1], [0], [0], [1], [0, 0, 1, 1], [], []>} : vector<8x128xbf16>, vector<128x128xbf16>, vector<8x128xf32> -> vector<8x128xf32>
    %c3_31 = arith.constant 3 : index
    %c0_32 = arith.constant 0 : index
    %c0_33 = arith.constant 0 : index
    %43 = vector.load %arg5[%c3_31, %c0_32, %c0_33] : memref<7x1x128xf32, #tpu.memory_space<vmem>>, vector<1x1x128xf32>
    %44 = vector.shape_cast %43 : vector<1x1x128xf32> to vector<1x128xf32>
    %45 = vector.broadcast %44 : vector<1x128xf32> to vector<8x128xf32>
    %46 = arith.addf %42, %45 : vector<8x128xf32>
    %cst_34 = arith.constant 0.000000e+00 : f32
    %47 = vector.broadcast %cst_34 : f32 to vector<8x128xf32>
    %48 = arith.maximumf %46, %47 : vector<8x128xf32>
    %49 = arith.truncf %48 : vector<8x128xf32> to vector<8x128xbf16>
    %c4 = arith.constant 4 : index
    %c0_35 = arith.constant 0 : index
    %c0_36 = arith.constant 0 : index
    %50 = vector.load %arg4[%c4, %c0_35, %c0_36] : memref<7x128x128xbf16, #tpu.memory_space<vmem>>, vector<1x128x128xbf16>
    %51 = vector.shape_cast %50 : vector<1x128x128xbf16> to vector<128x128xbf16>
    %cst_37 = arith.constant dense<0.000000e+00> : vector<8x128xf32>
    %52 = tpu.matmul %49, %51, %cst_37 {dimension_numbers = #tpu.dot_dimension_numbers<[1], [0], [0], [1], [0, 0, 1, 1], [], []>} : vector<8x128xbf16>, vector<128x128xbf16>, vector<8x128xf32> -> vector<8x128xf32>
    %c4_38 = arith.constant 4 : index
    %c0_39 = arith.constant 0 : index
    %c0_40 = arith.constant 0 : index
    %53 = vector.load %arg5[%c4_38, %c0_39, %c0_40] : memref<7x1x128xf32, #tpu.memory_space<vmem>>, vector<1x1x128xf32>
    %54 = vector.shape_cast %53 : vector<1x1x128xf32> to vector<1x128xf32>
    %55 = vector.broadcast %54 : vector<1x128xf32> to vector<8x128xf32>
    %56 = arith.addf %52, %55 : vector<8x128xf32>
    %cst_41 = arith.constant 0.000000e+00 : f32
    %57 = vector.broadcast %cst_41 : f32 to vector<8x128xf32>
    %58 = arith.maximumf %56, %57 : vector<8x128xf32>
    %59 = arith.truncf %58 : vector<8x128xf32> to vector<8x128xbf16>
    %c5 = arith.constant 5 : index
    %c0_42 = arith.constant 0 : index
    %c0_43 = arith.constant 0 : index
    %60 = vector.load %arg4[%c5, %c0_42, %c0_43] : memref<7x128x128xbf16, #tpu.memory_space<vmem>>, vector<1x128x128xbf16>
    %61 = vector.shape_cast %60 : vector<1x128x128xbf16> to vector<128x128xbf16>
    %cst_44 = arith.constant dense<0.000000e+00> : vector<8x128xf32>
    %62 = tpu.matmul %59, %61, %cst_44 {dimension_numbers = #tpu.dot_dimension_numbers<[1], [0], [0], [1], [0, 0, 1, 1], [], []>} : vector<8x128xbf16>, vector<128x128xbf16>, vector<8x128xf32> -> vector<8x128xf32>
    %c5_45 = arith.constant 5 : index
    %c0_46 = arith.constant 0 : index
    %c0_47 = arith.constant 0 : index
    %63 = vector.load %arg5[%c5_45, %c0_46, %c0_47] : memref<7x1x128xf32, #tpu.memory_space<vmem>>, vector<1x1x128xf32>
    %64 = vector.shape_cast %63 : vector<1x1x128xf32> to vector<1x128xf32>
    %65 = vector.broadcast %64 : vector<1x128xf32> to vector<8x128xf32>
    %66 = arith.addf %62, %65 : vector<8x128xf32>
    %cst_48 = arith.constant 0.000000e+00 : f32
    %67 = vector.broadcast %cst_48 : f32 to vector<8x128xf32>
    %68 = arith.maximumf %66, %67 : vector<8x128xf32>
    %69 = arith.truncf %68 : vector<8x128xf32> to vector<8x128xbf16>
    %c6 = arith.constant 6 : index
    %c0_49 = arith.constant 0 : index
    %c0_50 = arith.constant 0 : index
    %70 = vector.load %arg4[%c6, %c0_49, %c0_50] : memref<7x128x128xbf16, #tpu.memory_space<vmem>>, vector<1x128x128xbf16>
    %71 = vector.shape_cast %70 : vector<1x128x128xbf16> to vector<128x128xbf16>
    %cst_51 = arith.constant dense<0.000000e+00> : vector<8x128xf32>
    %72 = tpu.matmul %69, %71, %cst_51 {dimension_numbers = #tpu.dot_dimension_numbers<[1], [0], [0], [1], [0, 0, 1, 1], [], []>} : vector<8x128xbf16>, vector<128x128xbf16>, vector<8x128xf32> -> vector<8x128xf32>
    %c6_52 = arith.constant 6 : index
    %c0_53 = arith.constant 0 : index
    %c0_54 = arith.constant 0 : index
    %73 = vector.load %arg5[%c6_52, %c0_53, %c0_54] : memref<7x1x128xf32, #tpu.memory_space<vmem>>, vector<1x1x128xf32>
    %74 = vector.shape_cast %73 : vector<1x1x128xf32> to vector<1x128xf32>
    %75 = vector.broadcast %74 : vector<1x128xf32> to vector<8x128xf32>
    %76 = arith.addf %72, %75 : vector<8x128xf32>
    %c0_55 = arith.constant 0 : index
    %c0_56 = arith.constant 0 : index
    %77 = vector.load %arg6[%c0_55, %c0_56] : memref<8x128xf32, #tpu.memory_space<vmem>>, vector<8x128xf32>
    tpu.vector_store %arg6[%c0_55, %c0_56], %76 {strides = array<i32>} : memref<8x128xf32, #tpu.memory_space<vmem>>, vector<8x128xf32>,
    return
  }
  func.func @transform_0(%arg0: i32) -> (i32, i32) {
    %c0_i32 = arith.constant 0 : i32
    %c0_i32_0 = arith.constant 0 : i32
    return %arg0, %c0_i32 : i32, i32
  }
  func.func @transform_1(%arg0: i32) -> (i32, i32) {
    %c0_i32 = arith.constant 0 : i32
    %c0_i32_0 = arith.constant 0 : i32
    %c0_i32_1 = arith.constant 0 : i32
    return %c0_i32, %c0_i32_0 : i32, i32
  }
  func.func @transform_2(%arg0: i32) -> (i32, i32) {
    %c0_i32 = arith.constant 0 : i32
    %c0_i32_0 = arith.constant 0 : i32
    %c0_i32_1 = arith.constant 0 : i32
    return %c0_i32, %c0_i32_0 : i32, i32
  }
  func.func @transform_3(%arg0: i32) -> (i32, i32, i32) {
    %c0_i32 = arith.constant 0 : i32
    %c0_i32_0 = arith.constant 0 : i32
    %c0_i32_1 = arith.constant 0 : i32
    %c0_i32_2 = arith.constant 0 : i32
    return %c0_i32, %c0_i32_0, %c0_i32_1 : i32, i32, i32
  }
  func.func @transform_4(%arg0: i32) -> (i32, i32, i32) {
    %c0_i32 = arith.constant 0 : i32
    %c0_i32_0 = arith.constant 0 : i32
    %c0_i32_1 = arith.constant 0 : i32
    %c0_i32_2 = arith.constant 0 : i32
    return %c0_i32, %c0_i32_0, %c0_i32_1 : i32, i32, i32
  }
  func.func @transform_5(%arg0: i32) -> (i32, i32) {
    %c0_i32 = arith.constant 0 : i32
    %c0_i32_0 = arith.constant 0 : i32
    return %arg0, %c0_i32 : i32, i32
  }
}

module attributes {stable_mosaic.version = 11 : i64} {
  func.func @mapping_kernel(%arg0: i32, %arg1: memref<8x32xf32, #tpu.memory_space<vmem>>, %arg2: memref<32x128xbf16, #tpu.memory_space<vmem>>, %arg3: memref<1x128xf32, #tpu.memory_space<vmem>>, %arg4: memref<7x128x128xbf16, #tpu.memory_space<vmem>>, %arg5: memref<7x1x128xf32, #tpu.memory_space<vmem>>, %arg6: memref<8x128xf32, #tpu.memory_space<vmem>>) attributes {dimension_semantics = [#tpu.dimension_semantics<parallel>], iteration_bounds = array<i64: 1>, scalar_prefetch = 0 : i64, scratch_operands = 0 : i64, tpu.core_type = #tpu.core_type<tc>, window_params = [{transform_indices = @transform_0, window_bounds = array<i64: 8, 32>}, {pipeline_mode = #tpu.pipeline_mode<synchronous>, transform_indices = @transform_1, window_bounds = array<i64: 32, 128>}, {pipeline_mode = #tpu.pipeline_mode<synchronous>, transform_indices = @transform_2, window_bounds = array<i64: 1, 128>}, {pipeline_mode = #tpu.pipeline_mode<synchronous>, transform_indices = @transform_3, window_bounds = array<i64: 7, 128, 128>}, {pipeline_mode = #tpu.pipeline_mode<synchronous>, transform_indices = @transform_4, window_bounds = array<i64: 7, 1, 128>}, {transform_indices = @transform_5, window_bounds = array<i64: 8, 128>}]} {
    %c0 = arith.constant 0 : index
    %c0_0 = arith.constant 0 : index
    %0 = vector.load %arg1[%c0, %c0_0] : memref<8x32xf32, #tpu.memory_space<vmem>>, vector<8x32xf32>
    %1 = arith.truncf %0 : vector<8x32xf32> to vector<8x32xbf16>
    %c0_1 = arith.constant 0 : index
    %c0_2 = arith.constant 0 : index
    %2 = vector.load %arg2[%c0_1, %c0_2] : memref<32x128xbf16, #tpu.memory_space<vmem>>, vector<32x128xbf16>
    %cst = arith.constant dense<0.000000e+00> : vector<8x128xf32>
    %3 = tpu.matmul %1, %2, %cst {dimension_numbers = #tpu.dot_dimension_numbers<[1], [0], [0], [1], [0, 0, 1, 1], [], []>} : vector<8x32xbf16>, vector<32x128xbf16>, vector<8x128xf32> -> vector<8x128xf32>
    %c0_3 = arith.constant 0 : index
    %c0_4 = arith.constant 0 : index
    %4 = vector.load %arg3[%c0_3, %c0_4] : memref<1x128xf32, #tpu.memory_space<vmem>>, vector<1x128xf32>
    %5 = vector.broadcast %4 : vector<1x128xf32> to vector<8x128xf32>
    %6 = arith.addf %3, %5 : vector<8x128xf32>
    %cst_5 = arith.constant 0.000000e+00 : f32
    %7 = vector.broadcast %cst_5 : f32 to vector<8x128xf32>
    %8 = arith.maximumf %6, %7 : vector<8x128xf32>
    %9 = arith.truncf %8 : vector<8x128xf32> to vector<8x128xbf16>
    %c0_6 = arith.constant 0 : index
    %c0_7 = arith.constant 0 : index
    %c0_8 = arith.constant 0 : index
    %10 = vector.load %arg4[%c0_6, %c0_7, %c0_8] : memref<7x128x128xbf16, #tpu.memory_space<vmem>>, vector<1x128x128xbf16>
    %11 = vector.shape_cast %10 : vector<1x128x128xbf16> to vector<128x128xbf16>
    %cst_9 = arith.constant dense<0.000000e+00> : vector<8x128xf32>
    %12 = tpu.matmul %9, %11, %cst_9 {dimension_numbers = #tpu.dot_dimension_numbers<[1], [0], [0], [1], [0, 0, 1, 1], [], []>} : vector<8x128xbf16>, vector<128x128xbf16>, vector<8x128xf32> -> vector<8x128xf32>
    %c0_10 = arith.constant 0 : index
    %c0_11 = arith.constant 0 : index
    %c0_12 = arith.constant 0 : index
    %13 = vector.load %arg5[%c0_10, %c0_11, %c0_12] : memref<7x1x128xf32, #tpu.memory_space<vmem>>, vector<1x1x128xf32>
    %14 = vector.shape_cast %13 : vector<1x1x128xf32> to vector<1x128xf32>
    %15 = vector.broadcast %14 : vector<1x128xf32> to vector<8x128xf32>
    %16 = arith.addf %12, %15 : vector<8x128xf32>
    %cst_13 = arith.constant 0.000000e+00 : f32
    %17 = vector.broadcast %cst_13 : f32 to vector<8x128xf32>
    %18 = arith.maximumf %16, %17 : vector<8x128xf32>
    %19 = arith.truncf %18 : vector<8x128xf32> to vector<8x128xbf16>
    %c1 = arith.constant 1 : index
    %c0_14 = arith.constant 0 : index
    %c0_15 = arith.constant 0 : index
    %20 = vector.load %arg4[%c1, %c0_14, %c0_15] : memref<7x128x128xbf16, #tpu.memory_space<vmem>>, vector<1x128x128xbf16>
    %21 = vector.shape_cast %20 : vector<1x128x128xbf16> to vector<128x128xbf16>
    %cst_16 = arith.constant dense<0.000000e+00> : vector<8x128xf32>
    %22 = tpu.matmul %19, %21, %cst_16 {dimension_numbers = #tpu.dot_dimension_numbers<[1], [0], [0], [1], [0, 0, 1, 1], [], []>} : vector<8x128xbf16>, vector<128x128xbf16>, vector<8x128xf32> -> vector<8x128xf32>
    %c1_17 = arith.constant 1 : index
    %c0_18 = arith.constant 0 : index
    %c0_19 = arith.constant 0 : index
    %23 = vector.load %arg5[%c1_17, %c0_18, %c0_19] : memref<7x1x128xf32, #tpu.memory_space<vmem>>, vector<1x1x128xf32>
    %24 = vector.shape_cast %23 : vector<1x1x128xf32> to vector<1x128xf32>
    %25 = vector.broadcast %24 : vector<1x128xf32> to vector<8x128xf32>
    %26 = arith.addf %22, %25 : vector<8x128xf32>
    %cst_20 = arith.constant 0.000000e+00 : f32
    %27 = vector.broadcast %cst_20 : f32 to vector<8x128xf32>
    %28 = arith.maximumf %26, %27 : vector<8x128xf32>
    %29 = arith.truncf %28 : vector<8x128xf32> to vector<8x128xbf16>
    %c2 = arith.constant 2 : index
    %c0_21 = arith.constant 0 : index
    %c0_22 = arith.constant 0 : index
    %30 = vector.load %arg4[%c2, %c0_21, %c0_22] : memref<7x128x128xbf16, #tpu.memory_space<vmem>>, vector<1x128x128xbf16>
    %31 = vector.shape_cast %30 : vector<1x128x128xbf16> to vector<128x128xbf16>
    %cst_23 = arith.constant dense<0.000000e+00> : vector<8x128xf32>
    %32 = tpu.matmul %29, %31, %cst_23 {dimension_numbers = #tpu.dot_dimension_numbers<[1], [0], [0], [1], [0, 0, 1, 1], [], []>} : vector<8x128xbf16>, vector<128x128xbf16>, vector<8x128xf32> -> vector<8x128xf32>
    %c2_24 = arith.constant 2 : index
    %c0_25 = arith.constant 0 : index
    %c0_26 = arith.constant 0 : index
    %33 = vector.load %arg5[%c2_24, %c0_25, %c0_26] : memref<7x1x128xf32, #tpu.memory_space<vmem>>, vector<1x1x128xf32>
    %34 = vector.shape_cast %33 : vector<1x1x128xf32> to vector<1x128xf32>
    %35 = vector.broadcast %34 : vector<1x128xf32> to vector<8x128xf32>
    %36 = arith.addf %32, %35 : vector<8x128xf32>
    %cst_27 = arith.constant 0.000000e+00 : f32
    %37 = vector.broadcast %cst_27 : f32 to vector<8x128xf32>
    %38 = arith.maximumf %36, %37 : vector<8x128xf32>
    %39 = arith.truncf %38 : vector<8x128xf32> to vector<8x128xbf16>
    %c3 = arith.constant 3 : index
    %c0_28 = arith.constant 0 : index
    %c0_29 = arith.constant 0 : index
    %40 = vector.load %arg4[%c3, %c0_28, %c0_29] : memref<7x128x128xbf16, #tpu.memory_space<vmem>>, vector<1x128x128xbf16>
    %41 = vector.shape_cast %40 : vector<1x128x128xbf16> to vector<128x128xbf16>
    %cst_30 = arith.constant dense<0.000000e+00> : vector<8x128xf32>
    %42 = tpu.matmul %39, %41, %cst_30 {dimension_numbers = #tpu.dot_dimension_numbers<[1], [0], [0], [1], [0, 0, 1, 1], [], []>} : vector<8x128xbf16>, vector<128x128xbf16>, vector<8x128xf32> -> vector<8x128xf32>
    %c3_31 = arith.constant 3 : index
    %c0_32 = arith.constant 0 : index
    %c0_33 = arith.constant 0 : index
    %43 = vector.load %arg5[%c3_31, %c0_32, %c0_33] : memref<7x1x128xf32, #tpu.memory_space<vmem>>, vector<1x1x128xf32>
    %44 = vector.shape_cast %43 : vector<1x1x128xf32> to vector<1x128xf32>
    %45 = vector.broadcast %44 : vector<1x128xf32> to vector<8x128xf32>
    %46 = arith.addf %42, %45 : vector<8x128xf32>
    %cst_34 = arith.constant 0.000000e+00 : f32
    %47 = vector.broadcast %cst_34 : f32 to vector<8x128xf32>
    %48 = arith.maximumf %46, %47 : vector<8x128xf32>
    %49 = arith.truncf %48 : vector<8x128xf32> to vector<8x128xbf16>
    %c4 = arith.constant 4 : index
    %c0_35 = arith.constant 0 : index
    %c0_36 = arith.constant 0 : index
    %50 = vector.load %arg4[%c4, %c0_35, %c0_36] : memref<7x128x128xbf16, #tpu.memory_space<vmem>>, vector<1x128x128xbf16>
    %51 = vector.shape_cast %50 : vector<1x128x128xbf16> to vector<128x128xbf16>
    %cst_37 = arith.constant dense<0.000000e+00> : vector<8x128xf32>
    %52 = tpu.matmul %49, %51, %cst_37 {dimension_numbers = #tpu.dot_dimension_numbers<[1], [0], [0], [1], [0, 0, 1, 1], [], []>} : vector<8x128xbf16>, vector<128x128xbf16>, vector<8x128xf32> -> vector<8x128xf32>
    %c4_38 = arith.constant 4 : index
    %c0_39 = arith.constant 0 : index
    %c0_40 = arith.constant 0 : index
    %53 = vector.load %arg5[%c4_38, %c0_39, %c0_40] : memref<7x1x128xf32, #tpu.memory_space<vmem>>, vector<1x1x128xf32>
    %54 = vector.shape_cast %53 : vector<1x1x128xf32> to vector<1x128xf32>
    %55 = vector.broadcast %54 : vector<1x128xf32> to vector<8x128xf32>
    %56 = arith.addf %52, %55 : vector<8x128xf32>
    %cst_41 = arith.constant 0.000000e+00 : f32
    %57 = vector.broadcast %cst_41 : f32 to vector<8x128xf32>
    %58 = arith.maximumf %56, %57 : vector<8x128xf32>
    %59 = arith.truncf %58 : vector<8x128xf32> to vector<8x128xbf16>
    %c5 = arith.constant 5 : index
    %c0_42 = arith.constant 0 : index
    %c0_43 = arith.constant 0 : index
    %60 = vector.load %arg4[%c5, %c0_42, %c0_43] : memref<7x128x128xbf16, #tpu.memory_space<vmem>>, vector<1x128x128xbf16>
    %61 = vector.shape_cast %60 : vector<1x128x128xbf16> to vector<128x128xbf16>
    %cst_44 = arith.constant dense<0.000000e+00> : vector<8x128xf32>
    %62 = tpu.matmul %59, %61, %cst_44 {dimension_numbers = #tpu.dot_dimension_numbers<[1], [0], [0], [1], [0, 0, 1, 1], [], []>} : vector<8x128xbf16>, vector<128x128xbf16>, vector<8x128xf32> -> vector<8x128xf32>
    %c5_45 = arith.constant 5 : index
    %c0_46 = arith.constant 0 : index
    %c0_47 = arith.constant 0 : index
    %63 = vector.load %arg5[%c5_45, %c0_46, %c0_47] : memref<7x1x128xf32, #tpu.memory_space<vmem>>, vector<1x1x128xf32>
    %64 = vector.shape_cast %63 : vector<1x1x128xf32> to vector<1x128xf32>
    %65 = vector.broadcast %64 : vector<1x128xf32> to vector<8x128xf32>
    %66 = arith.addf %62, %65 : vector<8x128xf32>
    %cst_48 = arith.constant 0.000000e+00 : f32
    %67 = vector.broadcast %cst_48 : f32 to vector<8x128xf32>
    %68 = arith.maximumf %66, %67 : vector<8x128xf32>
    %69 = arith.truncf %68 : vector<8x128xf32> to vector<8x128xbf16>
    %c6 = arith.constant 6 : index
    %c0_49 = arith.constant 0 : index
    %c0_50 = arith.constant 0 : index
    %70 = vector.load %arg4[%c6, %c0_49, %c0_50] : memref<7x128x128xbf16, #tpu.memory_space<vmem>>, vector<1x128x128xbf16>
    %71 = vector.shape_cast %70 : vector<1x128x128xbf16> to vector<128x128xbf16>
    %cst_51 = arith.constant dense<0.000000e+00> : vector<8x128xf32>
    %72 = tpu.matmul %69, %71, %cst_51 {dimension_numbers = #tpu.dot_dimension_numbers<[1], [0], [0], [1], [0, 0, 1, 1], [], []>} : vector<8x128xbf16>, vector<128x128xbf16>, vector<8x128xf32> -> vector<8x128xf32>
    %c6_52 = arith.constant 6 : index
    %c0_53 = arith.constant 0 : index
    %c0_54 = arith.constant 0 : index
    %73 = vector.load %arg5[%c6_52, %c0_53, %c0_54] : memref<7x1x128xf32, #tpu.memory_space<vmem>>, vector<1x1x128xf32>
    %74 = vector.shape_cast %73 : vector<1x1x128xf32> to vector<1x128xf32>
    %75 = vector.broadcast %74 : vector<1x128xf32> to vector<8x128xf32>
    %76 = arith.addf %72, %75 : vector<8x128xf32>
    %c0_55 = arith.constant 0 : index
    %c0_56 = arith.constant 0 : index
    %77 = vector.load %arg6[%c0_55, %c0_56] : memref<8x128xf32, #tpu.memory_space<vmem>>, vector<8x128xf32>
    tpu.vector_store %arg6[%c0_55, %c0_56], %76 {strides = array<i32>} : memref<8x128xf32, #tpu.memory_space<vmem>>, vector<8x128xf32>,
    return
  }
  func.func @transform_0(%arg0: i32) -> (i32, i32) {
    %c0_i32 = arith.constant 0 : i32
    %c0_i32_0 = arith.constant 0 : i32
    return %arg0, %c0_i32 : i32, i32
  }
  func.func @transform_1(%arg0: i32) -> (i32, i32) {
    %c0_i32 = arith.constant 0 : i32
    %c0_i32_0 = arith.constant 0 : i32
    %c0_i32_1 = arith.constant 0 : i32
    return %c0_i32, %c0_i32_0 : i32, i32
  }
  func.func @transform_2(%arg0: i32) -> (i32, i32) {
    %c0_i32 = arith.constant 0 : i32
    %c0_i32_0 = arith.constant 0 : i32
    %c0_i32_1 = arith.constant 0 : i32
    return %c0_i32, %c0_i32_0 : i32, i32
  }
  func.func @transform_3(%arg0: i32) -> (i32, i32, i32) {
    %c0_i32 = arith.constant 0 : i32
    %c0_i32_0 = arith.constant 0 : i32
    %c0_i32_1 = arith.constant 0 : i32
    %c0_i32_2 = arith.constant 0 : i32
    return %c0_i32, %c0_i32_0, %c0_i32_1 : i32, i32, i32
  }
  func.func @transform_4(%arg0: i32) -> (i32, i32, i32) {
    %c0_i32 = arith.constant 0 : i32
    %c0_i32_0 = arith.constant 0 : i32
    %c0_i32_1 = arith.constant 0 : i32
    %c0_i32_2 = arith.constant 0 : i32
    return %c0_i32, %c0_i32_0, %c0_i32_1 : i32, i32, i32
  }
  func.func @transform_5(%arg0: i32) -> (i32, i32) {
    %c0_i32 = arith.constant 0 : i32
    %c0_i32_0 = arith.constant 0 : i32
    return %arg0, %c0_i32 : i32, i32
  }
}

</mosaic_0001>

<bundles_post_ra>
// kernel: tpu_custom_call.1
= control target key start
LH: loop header
LB: loop body
LE: loop exit
PB: predicated region body
PF: predicated region fallthrough
CT: control target
= control target key end

     0   :  { %10 = vsyncpa [#allocation3], 0  ;;  %s1587_s0 = inlined_call_operand.hbm [shape: f32[8,32], index: 0, kind: input, shape index: {}]   ;;  %s1588_s1 = inlined_call_operand.hbm [shape: bf16[32,128], index: 1, kind: input, shape index: {}]   ;;  %s1589_s2 = inlined_call_operand.vmem [shape: f32[1,128], index: 2, kind: input, shape index: {}]   ;;  %s1590_s3 = inlined_call_operand.hbm [shape: bf16[7,128,128], index: 3, kind: input, shape index: {}]   ;;  %s1591_s4 = inlined_call_operand.vmem [shape: f32[7,1,128], index: 4, kind: input, shape index: {}]   ;;  %s1592_s5 = inlined_call_operand.hbm [shape: f32[8,128], index: 5, kind: output, shape index: {}]  }
   0x1   :  { %11 = vsyncpa [#allocation6], 0 }
   0x2   :  { %12 = vsyncpa [#allocation4], 0  ;;  %s1397_s18 = smov [#allocation5]   ;;  %s1303_s22 = scalar_lea.hbm %s1588_s1, 256 }
   0x3   :  { %s28_s19 = sshll.u32 %s1397_s18, 4  ;;  %p1304_p0 = scmp.ne.s32.totalorder %s1588_s1, %s1303_s22  ;;  %s29_s19 = int_to_ptr.vmem [resolvable:$true] %s28_s19 }
   0x4   :  { %p1307_p1 = scmp.lt.u32.totalorder %s1303_s22, %s1588_s1 }
   0x6   :  { %p1309_p2 = pnand %p1307_p1, %p1304_p0 }
   0x8   :  { %1312 = shalt.err (!%p1309_p2)
}
   0x9   :  { %s1313_s27 = scalar_lea.vmem %s29_s19, 256  ;;  %p1318_p4 = scmp.lt.s32.totalorder %s29_s19, %s29_s19 }
   0xa   :  { %p1314_p3 = scmp.ne.s32.totalorder %s29_s19, %s1313_s27  ;;  %p1319_p5 = scmp.lt.s32.totalorder %s1313_s27, %s1313_s27 }
   0xc   :  { %p1320_p6 = por %p1319_p5, %p1318_p4 }
   0xe   :  { %p1321_p7 = pnand %p1320_p6, %p1314_p3 }
  0x10   :  { %1324 = shalt.err (!%p1321_p7)
}
  0x11   :  { %s1398_s28 = smov 64   ;;  %s1399_s29 = smov 4  }
  0x12   :  { %34 = dma.hbm_to_vmem [thread:$0]  %s1588_s1, 256, %s29_s19, [#allocation6], %s1398_s28, %s1398_s28, %s1399_s29  }
  0x13   :  { %s1400_s7 = smov [#allocation2]   ;;  %s1401_s9 = smov [#allocation7]  }
  0x14   :  { %s19_s8 = sshll.u32 %s1400_s7, 4  ;;  %s42_s10 = sshll.u32 %s1401_s9, 4  ;;  %s20_s8 = int_to_ptr.vmem [resolvable:$true] %s19_s8  ;;  %s43_s10 = int_to_ptr.vmem [resolvable:$true] %s42_s10 }
  0x15   :  { %s1325_s13 = scalar_lea.hbm %s1587_s0, 128 }
  0x16   :  { %p1326_p8 = scmp.ne.s32.totalorder %s1587_s0, %s1325_s13  ;;  %p1329_p9 = scmp.lt.u32.totalorder %s1325_s13, %s1587_s0 }
  0x18   :  { %p1331_p10 = pnand %p1329_p9, %p1326_p8 }
  0x1a   :  { %1334 = shalt.err (!%p1331_p10)
}
  0x1b   :  { %s1335_s1 = scalar_lea.vmem %s20_s8, 128  ;;  %p1340_p12 = scmp.lt.s32.totalorder %s20_s8, %s20_s8 }
  0x1c   :  { %p1336_p11 = scmp.ne.s32.totalorder %s20_s8, %s1335_s1  ;;  %p1341_p13 = scmp.lt.s32.totalorder %s1335_s1, %s1335_s1 }
  0x1e   :  { %p1342_p0 = por %p1341_p13, %p1340_p12 }
  0x20   :  { %p1343_p1 = pnand %p1342_p0, %p1336_p11 }
  0x22   :  { %1346 = shalt.err (!%p1343_p1)
}
  0x23   :  { %22 = dma.hbm_to_vmem [thread:$0]  %s1587_s0, 128, %s20_s8, [#allocation3]  }
  0x24   :  { %s1347_s22 = scalar_lea.hbm %s1590_s3, 7168 }
  0x25   :  { %p1348_p2 = scmp.ne.s32.totalorder %s1590_s3, %s1347_s22  ;;  %p1351_p3 = scmp.lt.u32.totalorder %s1347_s22, %s1590_s3 }
  0x27   :  { %p1353_p4 = pnand %p1351_p3, %p1348_p2 }
  0x29   :  { %1356 = shalt.err (!%p1353_p4)
}
  0x2a   :  { %s1357_s27 = scalar_lea.vmem %s43_s10, 7168  ;;  %p1362_p6 = scmp.lt.s32.totalorder %s43_s10, %s43_s10 }
  0x2b   :  { %p1358_p5 = scmp.ne.s32.totalorder %s43_s10, %s1357_s27  ;;  %p1363_p7 = scmp.lt.s32.totalorder %s1357_s27, %s1357_s27 }
  0x2d   :  { %p1364_p8 = por %p1363_p7, %p1362_p6 }
  0x2f   :  { %p1365_p9 = pnand %p1364_p8, %p1358_p5 }
  0x31   :  { %1368 = shalt.err (!%p1365_p9)
}
  0x32   :  { %48 = dma.hbm_to_vmem [thread:$0]  %s1590_s3, 7168, %s43_s10, [#allocation6], %s1398_s28, %s1398_s28, %s1399_s29  }
  0x33   :  { %1391 = dma.done.wait [#allocation3], 128  }
  0x34   :  { %1392 = vsyncadd [#allocation3], 4294967168 }
  0x35   :  { %1393 = dma.done.wait [#allocation6], 7424  }
  0x36   :  { %1394 = vsyncadd [#allocation6], 4294959872  ;;  %v1402_v0 = vmov 0.0   ;;  %vm1403_vm0 = vmmov 0   ;;  %v1245_v1 = vld [vmem:[#allocation5] sm:$0xff]   ;;  %v1246_v2 = vld [vmem:[#allocation5 + $0x8] sm:$0xff]  }
  0x37   :  { %1089 = vmatprep.subr.bf16.mxu0 %v1402_v0  ;;  %1093 = vmatprep.mubr.msk.bf16.mxu0 %vm1403_vm0, %v1402_v0  ;;  %v61_v3 = vld [vmem:[#allocation2] sm:$0xff]  ;;  %v1247_v4 = vld [vmem:[#allocation7] sm:$0xff]   ;;  %vm86_vm1 = vcmask 261120   ;;  %v1249_v7 = vld [vmem:[#allocation7 + $0x10] sm:$0xff]   ;;  %s1404_s1 = smov [#allocation8]  }
  0x38   :  { %1097 = vmatprep.subr.bf16.mxu1 %v1402_v0  ;;  %1113 = vmatprep.mubr.msk.bf16.mxu1 %vm1403_vm0, %v1402_v0  ;;  %v62_v5 = vpack.c.bf16 %v61_v3, %v61_v3  ;;  %v1248_v6 = vld [vmem:[#allocation7 + $0x8] sm:$0xff]   ;;  %v1250_v8 = vld [vmem:[#allocation7 + $0x18] sm:$0xff]   ;;  %v1251_v9 = vld [vmem:[#allocation7 + $0x20] sm:$0xff]   ;;  %s940_s18 = sshll.u32 %s1404_s1, 4  ;;  %s941_s18 = int_to_ptr.vmem [resolvable:$true] %s940_s18 }
  0x39   :  { %1090 = vmatpush3.bf16.msra.mxu0 %v1245_v1  ;;  %1098 = vmatpush3.bf16.msra.mxu1 %v1247_v4  ;;  %v1252_v10 = vld [vmem:[#allocation7 + $0x28] sm:$0xff]   ;;  %v1253_v11 = vld [vmem:[#allocation7 + $0x30] sm:$0xff]   ;;  %v1254_v12 = vld [vmem:[#allocation7 + $0x38] sm:$0xff]   ;;  %s1369_s19 = scalar_lea.vmem %s941_s18, 128  ;;  %p1374_p11 = scmp.lt.s32.totalorder %s941_s18, %s941_s18 }
  0x3a   :  { %1091 = vmatprep.subr.bf16.mxu0 %v1402_v0  ;;  %1099 = vmatprep.subr.bf16.mxu1 %v1402_v0  ;;  %v1255_v13 = vld [vmem:[#allocation7 + $0x40] sm:$0xff]   ;;  %v1256_v14 = vld [vmem:[#allocation7 + $0x48] sm:$0xff]   ;;  %v1257_v15 = vld [vmem:[#allocation7 + $0x50] sm:$0xff]   ;;  %p1370_p10 = scmp.ne.s32.totalorder %s941_s18, %s1369_s19  ;;  %p1375_p12 = scmp.lt.s32.totalorder %s1369_s19, %s1369_s19 }
  0x3b   :  { %v1258_v16 = vld [vmem:[#allocation7 + $0x58] sm:$0xff]   ;;  %v1259_v17 = vld [vmem:[#allocation7 + $0x60] sm:$0xff]   ;;  %v1260_v18 = vld [vmem:[#allocation7 + $0x68] sm:$0xff]  }
  0x3c   :  { %v950_v19 = vld [vmem:[%s1589_s2] ss:$0 sm:$0xff]  ;;  %v1261_v27 = vld [vmem:[#allocation7 + $0x70] sm:$0xff]   ;;  %v1262_v28 = vld [vmem:[#allocation7 + $0x78] sm:$0xff]   ;;  %p1376_p13 = por %p1375_p12, %p1374_p11 }
  0x3d   :  { %1092 = vmatpush3.bf16.msra.mxu0 %v1246_v2  ;;  %1100 = vmatpush3.bf16.msra.mxu1 %v1248_v6  ;;  %v1263_v29 = vld [vmem:[#allocation7 + $0x80] sm:$0xff]   ;;  %v1264_v30 = vld [vmem:[#allocation7 + $0x88] sm:$0xff]   ;;  %v1265_v31 = vld [vmem:[#allocation7 + $0x90] sm:$0xff]  }
  0x3e   :  { %1117 = vmatprep.subr.bf16.mxu0 %v1402_v0  ;;  %1101 = vmatprep.subr.bf16.mxu1 %v1402_v0  ;;  %v1266_v32 = vld [vmem:[#allocation7 + $0x98] sm:$0xff]   ;;  %v1267_v33 = vld [vmem:[#allocation7 + $0xa0] sm:$0xff]   ;;  %v1268_v34 = vld [vmem:[#allocation7 + $0xa8] sm:$0xff]   ;;  %p1377_p0 = pnand %p1376_p13, %p1370_p10 }
  0x3f   :  { %v954_v35 = vld [vmem:[%s1591_s4] ss:$0 sm:$0xff]  ;;  %v1269_v43 = vld [vmem:[#allocation7 + $0xb0] sm:$0xff]   ;;  %v1270_v44 = vld [vmem:[#allocation7 + $0xb8] sm:$0xff]  }
  0x40   :  { %1094 = vmatmul.mubr.msk.bf16.vlgmr.msra.gmra.mrb[0].mxu0 %vm86_vm1, %v62_v5  ;;  %v1271_v45 = vld [vmem:[#allocation7 + $0xc0] sm:$0xff]   ;;  %v1272_v46 = vld [vmem:[#allocation7 + $0xc8] sm:$0xff]   ;;  %v1273_v47 = vld [vmem:[#allocation7 + $0xd0] sm:$0xff]  }
  0x41   :  { %1133 = vmatprep.mubr.msk.bf16.mxu0 %vm1403_vm0, %v1402_v0  ;;  %1102 = vmatpush3.bf16.msra.mxu1 %v1249_v7  ;;  %v1274_v48 = vld [vmem:[#allocation7 + $0xd8] sm:$0xff]   ;;  %v1275_v49 = vld [vmem:[#allocation7 + $0xe0] sm:$0xff]   ;;  %v1276_v50 = vld [vmem:[#allocation7 + $0xe8] sm:$0xff]  }
  0x42   :  { %1103 = vmatprep.subr.bf16.mxu1 %v1402_v0  ;;  %1118 = vmatpush3.bf16.msra.mxu0 %v1255_v13  ;;  %v964_v51 = vld [vmem:[%s1591_s4 + $0x1] ss:$0 sm:$0xff]  ;;  %v1277_v59 = vld [vmem:[#allocation7 + $0xf0] sm:$0xff]   ;;  %v1278_v60 = vld [vmem:[#allocation7 + $0xf8] sm:$0xff]  }
  0x43   :  { %1119 = vmatprep.subr.bf16.mxu0 %v1402_v0  ;;  %v1279_v61 = vld [vmem:[#allocation7 + $0x100] sm:$0xff]   ;;  %v1280_v62 = vld [vmem:[#allocation7 + $0x108] sm:$0xff]   ;;  %v1281_v63 = vld [vmem:[#allocation7 + $0x110] sm:$0xff]  }
  0x44   :  { %v1282_v1 = vld [vmem:[#allocation7 + $0x118] sm:$0xff]   ;;  %v1283_v2 = vld [vmem:[#allocation7 + $0x120] sm:$0xff]   ;;  %v1284_v3 = vld [vmem:[#allocation7 + $0x128] sm:$0xff]  }
  0x45   :  { %1104 = vmatpush3.bf16.msra.mxu1 %v1250_v8  ;;  %v974_v4 = vld [vmem:[%s1591_s4 + $0x2] ss:$0 sm:$0xff]  ;;  %v1286_v13 = vld [vmem:[#allocation7 + $0x138] sm:$0xff]  }
  0x46   :  { %1105 = vmatprep.subr.bf16.mxu1 %v1402_v0  ;;  %1120 = vmatpush3.bf16.msra.mxu0 %v1256_v14  ;;  %v1287_v14 = vld [vmem:[#allocation7 + $0x140] sm:$0xff]  }
  0x47   :  { %1121 = vmatprep.subr.bf16.mxu0 %v1402_v0 }
  0x49   :  { %1106 = vmatpush3.bf16.msra.mxu1 %v1251_v9 }
  0x4a   :  { %1107 = vmatprep.subr.bf16.mxu1 %v1402_v0  ;;  %1122 = vmatpush3.bf16.msra.mxu0 %v1257_v15  ;;  %v1288_v15 = vld [vmem:[#allocation7 + $0x148] sm:$0xff]  }
  0x4b   :  { %1123 = vmatprep.subr.bf16.mxu0 %v1402_v0 }
  0x4d   :  { %1108 = vmatpush3.bf16.msra.mxu1 %v1252_v10 }
  0x4e   :  { %1109 = vmatprep.subr.bf16.mxu1 %v1402_v0  ;;  %1124 = vmatpush3.bf16.msra.mxu0 %v1258_v16  ;;  %v1289_v16 = vld [vmem:[#allocation7 + $0x150] sm:$0xff]  }
  0x4f   :  { %1125 = vmatprep.subr.bf16.mxu0 %v1402_v0 }
  0x51   :  { %1110 = vmatpush3.bf16.msra.mxu1 %v1253_v11 }
  0x52   :  { %1111 = vmatprep.subr.bf16.mxu1 %v1402_v0  ;;  %1126 = vmatpush3.bf16.msra.mxu0 %v1259_v17  ;;  %v1290_v17 = vld [vmem:[#allocation7 + $0x158] sm:$0xff]  }
  0x53   :  { %1127 = vmatprep.subr.bf16.mxu0 %v1402_v0 }
  0x55   :  { %1112 = vmatpush3.bf16.msra.mxu1 %v1254_v12  ;;  %v1285_v12 = vld [vmem:[#allocation7 + $0x130] sm:$0xff]  }
  0x56   :  { %1137 = vmatprep.subr.bf16.mxu1 %v1402_v0  ;;  %1128 = vmatpush3.bf16.msra.mxu0 %v1260_v18  ;;  %v1291_v18 = vld [vmem:[#allocation7 + $0x160] sm:$0xff]  }
  0x57   :  { %1129 = vmatprep.subr.bf16.mxu0 %v1402_v0 }
  0x5a   :  { %1130 = vmatpush3.bf16.msra.mxu0 %v1261_v27 }
  0x5b   :  { %1131 = vmatprep.subr.bf16.mxu0 %v1402_v0 }
  0x5e   :  { %1132 = vmatpush3.bf16.msra.mxu0 %v1262_v28  ;;  %v1293_v28 = vld [vmem:[#allocation7 + $0x170] sm:$0xff]  }
  0x5f   :  { %1157 = vmatprep.subr.bf16.mxu0 %v1402_v0 }
 0x113   :  { %v124_v20 = vpop.f32.mrb[0].mxu0 }
 0x114   :  { %v125_v21 = vadd.f32 %v950_v19, %v124_v20  ;;  %v1095_v22 = vpop.f32.mrb[1].mxu0  ;;  %v1292_v19 = vld [vmem:[#allocation7 + $0x168] sm:$0xff]  }
 0x115   :  { %v127_v23 = vpop.f32.mrb[2].mxu0  ;;  %v984_v20 = vld [vmem:[%s1591_s4 + $0x3] ss:$0 sm:$0xff] }
 0x116   :  { %v130_v24 = vmax.f32 %v125_v21, 0.0  ;;  %v1096_v25 = vpop.f32.mrb[3].mxu0 }
 0x118   :  { %v131_v26 = vpack.c.bf16 %v130_v24, %v130_v24 }
 0x11a   :  { %1114 = vmatmul.mubr.bf16.vlgmr.msra.gmra.mrb[0].mxu1 %v131_v26 }
 0x11b   :  { %1153 = vmatprep.mubr.msk.bf16.mxu1 %vm1403_vm0, %v1402_v0  ;;  %1138 = vmatpush3.bf16.msra.mxu1 %v1263_v29  ;;  %v1294_v29 = vld [vmem:[#allocation7 + $0x178] sm:$0xff]  }
 0x11c   :  { %1139 = vmatprep.subr.bf16.mxu1 %v1402_v0 }
 0x11f   :  { %1140 = vmatpush3.bf16.msra.mxu1 %v1264_v30  ;;  %v1295_v30 = vld [vmem:[#allocation7 + $0x180] sm:$0xff]  }
 0x120   :  { %1141 = vmatprep.subr.bf16.mxu1 %v1402_v0 }
 0x123   :  { %1142 = vmatpush3.bf16.msra.mxu1 %v1265_v31  ;;  %v1296_v31 = vld [vmem:[#allocation7 + $0x188] sm:$0xff]  }
 0x124   :  { %1143 = vmatprep.subr.bf16.mxu1 %v1402_v0 }
 0x127   :  { %1144 = vmatpush3.bf16.msra.mxu1 %v1266_v32  ;;  %v1297_v32 = vld [vmem:[#allocation7 + $0x190] sm:$0xff]  }
 0x128   :  { %1145 = vmatprep.subr.bf16.mxu1 %v1402_v0 }
 0x12b   :  { %1146 = vmatpush3.bf16.msra.mxu1 %v1267_v33  ;;  %v1298_v33 = vld [vmem:[#allocation7 + $0x198] sm:$0xff]  }
 0x12c   :  { %1147 = vmatprep.subr.bf16.mxu1 %v1402_v0 }
 0x12f   :  { %1148 = vmatpush3.bf16.msra.mxu1 %v1268_v34  ;;  %v1299_v34 = vld [vmem:[#allocation7 + $0x1a0] sm:$0xff]  }
 0x130   :  { %1149 = vmatprep.subr.bf16.mxu1 %v1402_v0 }
 0x133   :  { %1150 = vmatpush3.bf16.msra.mxu1 %v1269_v43 }
 0x134   :  { %1151 = vmatprep.subr.bf16.mxu1 %v1402_v0 }
 0x137   :  { %1152 = vmatpush3.bf16.msra.mxu1 %v1270_v44  ;;  %v1301_v44 = vld [vmem:[#allocation7 + $0x1b0] sm:$0xff]  }
 0x138   :  { %1177 = vmatprep.subr.bf16.mxu1 %v1402_v0 }
 0x1ed   :  { %v237_v36 = vpop.f32.mrb[0].mxu1 }
 0x1ee   :  { %v238_v37 = vadd.f32 %v954_v35, %v237_v36  ;;  %v1115_v38 = vpop.f32.mrb[1].mxu1  ;;  %v1300_v35 = vld [vmem:[#allocation7 + $0x1a8] sm:$0xff]  }
 0x1ef   :  { %v240_v39 = vpop.f32.mrb[2].mxu1  ;;  %v994_v36 = vld [vmem:[%s1591_s4 + $0x4] ss:$0 sm:$0xff] }
 0x1f0   :  { %v243_v40 = vmax.f32 %v238_v37, 0.0  ;;  %v1116_v41 = vpop.f32.mrb[3].mxu1 }
 0x1f2   :  { %v244_v42 = vpack.c.bf16 %v243_v40, %v243_v40 }
 0x1f4   :  { %1134 = vmatmul.mubr.bf16.vlgmr.msra.gmra.mrb[4].mxu0 %v244_v42 }
 0x1f5   :  { %1173 = vmatprep.mubr.msk.bf16.mxu0 %vm1403_vm0, %v1402_v0  ;;  %1158 = vmatpush3.bf16.msra.mxu0 %v1271_v45  ;;  %v1302_v45 = vld [vmem:[#allocation7 + $0x1b8] sm:$0xff]  }
 0x1f6   :  { %1159 = vmatprep.subr.bf16.mxu0 %v1402_v0 }
 0x1f9   :  { %1160 = vmatpush3.bf16.msra.mxu0 %v1272_v46  ;;  %v1004_v46 = vld [vmem:[%s1591_s4 + $0x5] ss:$0 sm:$0xff] }
 0x1fa   :  { %1161 = vmatprep.subr.bf16.mxu0 %v1402_v0 }
 0x1fd   :  { %1162 = vmatpush3.bf16.msra.mxu0 %v1273_v47 }
 0x1fe   :  { %1163 = vmatprep.subr.bf16.mxu0 %v1402_v0 }
 0x201   :  { %1164 = vmatpush3.bf16.msra.mxu0 %v1274_v48 }
 0x202   :  { %1165 = vmatprep.subr.bf16.mxu0 %v1402_v0 }
 0x205   :  { %1166 = vmatpush3.bf16.msra.mxu0 %v1275_v49 }
 0x206   :  { %1167 = vmatprep.subr.bf16.mxu0 %v1402_v0 }
 0x209   :  { %1168 = vmatpush3.bf16.msra.mxu0 %v1276_v50 }
 0x20a   :  { %1169 = vmatprep.subr.bf16.mxu0 %v1402_v0 }
 0x20d   :  { %1170 = vmatpush3.bf16.msra.mxu0 %v1277_v59 }
 0x20e   :  { %1171 = vmatprep.subr.bf16.mxu0 %v1402_v0 }
 0x211   :  { %1172 = vmatpush3.bf16.msra.mxu0 %v1278_v60 }
 0x212   :  { %1197 = vmatprep.subr.bf16.mxu0 %v1402_v0 }
 0x2c7   :  { %v352_v52 = vpop.f32.mrb[4].mxu0 }
 0x2c8   :  { %v353_v53 = vadd.f32 %v964_v51, %v352_v52  ;;  %v1135_v54 = vpop.f32.mrb[5].mxu0 }
 0x2c9   :  { %v355_v55 = vpop.f32.mrb[6].mxu0  ;;  %v1014_v54 = vld [vmem:[%s1591_s4 + $0x6] ss:$0 sm:$0xff] }
 0x2ca   :  { %v358_v56 = vmax.f32 %v353_v53, 0.0  ;;  %v1136_v57 = vpop.f32.mrb[7].mxu0 }
 0x2cc   :  { %v359_v58 = vpack.c.bf16 %v358_v56, %v358_v56 }
 0x2ce   :  { %1154 = vmatmul.mubr.bf16.vlgmr.msra.gmra.mrb[4].mxu1 %v359_v58 }
 0x2cf   :  { %1193 = vmatprep.mubr.msk.bf16.mxu1 %vm1403_vm0, %v1402_v0  ;;  %1178 = vmatpush3.bf16.msra.mxu1 %v1279_v61 }
 0x2d0   :  { %1179 = vmatprep.subr.bf16.mxu1 %v1402_v0 }
 0x2d3   :  { %1180 = vmatpush3.bf16.msra.mxu1 %v1280_v62 }
 0x2d4   :  { %1181 = vmatprep.subr.bf16.mxu1 %v1402_v0 }
 0x2d7   :  { %1182 = vmatpush3.bf16.msra.mxu1 %v1281_v63 }
 0x2d8   :  { %1183 = vmatprep.subr.bf16.mxu1 %v1402_v0 }
 0x2db   :  { %1184 = vmatpush3.bf16.msra.mxu1 %v1282_v1 }
 0x2dc   :  { %1185 = vmatprep.subr.bf16.mxu1 %v1402_v0 }
 0x2df   :  { %1186 = vmatpush3.bf16.msra.mxu1 %v1283_v2 }
 0x2e0   :  { %1187 = vmatprep.subr.bf16.mxu1 %v1402_v0 }
 0x2e3   :  { %1188 = vmatpush3.bf16.msra.mxu1 %v1284_v3 }
 0x2e4   :  { %1189 = vmatprep.subr.bf16.mxu1 %v1402_v0 }
 0x2e7   :  { %1190 = vmatpush3.bf16.msra.mxu1 %v1285_v12 }
 0x2e8   :  { %1191 = vmatprep.subr.bf16.mxu1 %v1402_v0 }
 0x2eb   :  { %1192 = vmatpush3.bf16.msra.mxu1 %v1286_v13 }
 0x2ec   :  { %1217 = vmatprep.subr.bf16.mxu1 %v1402_v0 }
 0x3a1   :  { %v467_v5 = vpop.f32.mrb[4].mxu1 }
 0x3a2   :  { %v468_v6 = vadd.f32 %v974_v4, %v467_v5  ;;  %v1155_v7 = vpop.f32.mrb[5].mxu1 }
 0x3a3   :  { %v470_v8 = vpop.f32.mrb[6].mxu1 }
 0x3a4   :  { %v473_v9 = vmax.f32 %v468_v6, 0.0  ;;  %v1156_v10 = vpop.f32.mrb[7].mxu1 }
 0x3a6   :  { %v474_v11 = vpack.c.bf16 %v473_v9, %v473_v9 }
 0x3a8   :  { %1174 = vmatmul.mubr.bf16.vlgmr.msra.gmra.mrb[8].mxu0 %v474_v11 }
 0x3a9   :  { %1213 = vmatprep.mubr.msk.bf16.mxu0 %vm1403_vm0, %v1402_v0  ;;  %1198 = vmatpush3.bf16.msra.mxu0 %v1287_v14 }
 0x3aa   :  { %1199 = vmatprep.subr.bf16.mxu0 %v1402_v0 }
 0x3ad   :  { %1200 = vmatpush3.bf16.msra.mxu0 %v1288_v15 }
 0x3ae   :  { %1201 = vmatprep.subr.bf16.mxu0 %v1402_v0 }
 0x3b1   :  { %1202 = vmatpush3.bf16.msra.mxu0 %v1289_v16 }
 0x3b2   :  { %1203 = vmatprep.subr.bf16.mxu0 %v1402_v0 }
 0x3b5   :  { %1204 = vmatpush3.bf16.msra.mxu0 %v1290_v17 }
 0x3b6   :  { %1205 = vmatprep.subr.bf16.mxu0 %v1402_v0 }
 0x3b9   :  { %1206 = vmatpush3.bf16.msra.mxu0 %v1291_v18 }
 0x3ba   :  { %1207 = vmatprep.subr.bf16.mxu0 %v1402_v0 }
 0x3bd   :  { %1208 = vmatpush3.bf16.msra.mxu0 %v1292_v19 }
 0x3be   :  { %1209 = vmatprep.subr.bf16.mxu0 %v1402_v0 }
 0x3c1   :  { %1210 = vmatpush3.bf16.msra.mxu0 %v1293_v28 }
 0x3c2   :  { %1211 = vmatprep.subr.bf16.mxu0 %v1402_v0 }
 0x3c5   :  { %1212 = vmatpush3.bf16.msra.mxu0 %v1294_v29 }
 0x47b   :  { %v582_v21 = vpop.f32.mrb[8].mxu0 }
 0x47c   :  { %v583_v22 = vadd.f32 %v984_v20, %v582_v21  ;;  %v1175_v23 = vpop.f32.mrb[9].mxu0 }
 0x47d   :  { %v585_v24 = vpop.f32.mrb[10].mxu0 }
 0x47e   :  { %v588_v25 = vmax.f32 %v583_v22, 0.0  ;;  %v1176_v26 = vpop.f32.mrb[11].mxu0 }
 0x480   :  { %v589_v27 = vpack.c.bf16 %v588_v25, %v588_v25 }
 0x482   :  { %1194 = vmatmul.mubr.bf16.vlgmr.msra.gmra.mrb[8].mxu1 %v589_v27 }
 0x483   :  { %1233 = vmatprep.mubr.msk.bf16.mxu1 %vm1403_vm0, %v1402_v0  ;;  %1218 = vmatpush3.bf16.msra.mxu1 %v1295_v30 }
 0x484   :  { %1219 = vmatprep.subr.bf16.mxu1 %v1402_v0 }
 0x487   :  { %1220 = vmatpush3.bf16.msra.mxu1 %v1296_v31 }
 0x488   :  { %1221 = vmatprep.subr.bf16.mxu1 %v1402_v0 }
 0x48b   :  { %1222 = vmatpush3.bf16.msra.mxu1 %v1297_v32 }
 0x48c   :  { %1223 = vmatprep.subr.bf16.mxu1 %v1402_v0 }
 0x48f   :  { %1224 = vmatpush3.bf16.msra.mxu1 %v1298_v33 }
 0x490   :  { %1225 = vmatprep.subr.bf16.mxu1 %v1402_v0 }
 0x493   :  { %1226 = vmatpush3.bf16.msra.mxu1 %v1299_v34 }
 0x494   :  { %1227 = vmatprep.subr.bf16.mxu1 %v1402_v0 }
 0x497   :  { %1228 = vmatpush3.bf16.msra.mxu1 %v1300_v35 }
 0x498   :  { %1229 = vmatprep.subr.bf16.mxu1 %v1402_v0 }
 0x49b   :  { %1230 = vmatpush3.bf16.msra.mxu1 %v1301_v44 }
 0x49c   :  { %1231 = vmatprep.subr.bf16.mxu1 %v1402_v0 }
 0x49f   :  { %1232 = vmatpush3.bf16.msra.mxu1 %v1302_v45 }
 0x555   :  { %v697_v37 = vpop.f32.mrb[8].mxu1 }
 0x556   :  { %v698_v38 = vadd.f32 %v994_v36, %v697_v37  ;;  %v1195_v39 = vpop.f32.mrb[9].mxu1 }
 0x557   :  { %v700_v40 = vpop.f32.mrb[10].mxu1 }
 0x558   :  { %v703_v41 = vmax.f32 %v698_v38, 0.0  ;;  %v1196_v42 = vpop.f32.mrb[11].mxu1 }
 0x55a   :  { %v704_v43 = vpack.c.bf16 %v703_v41, %v703_v41 }
 0x55c   :  { %1214 = vmatmul.mubr.bf16.vlgmr.msra.gmra.mrb[12].mxu0 %v704_v43 }
 0x62f   :  { %v812_v47 = vpop.f32.mrb[12].mxu0 }
 0x630   :  { %v813_v48 = vadd.f32 %v1004_v46, %v812_v47  ;;  %v1215_v49 = vpop.f32.mrb[13].mxu0 }
 0x631   :  { %v815_v50 = vpop.f32.mrb[14].mxu0 }
 0x632   :  { %v818_v51 = vmax.f32 %v813_v48, 0.0  ;;  %v1216_v52 = vpop.f32.mrb[15].mxu0 }
 0x634   :  { %v819_v53 = vpack.c.bf16 %v818_v51, %v818_v51 }
 0x636   :  { %1234 = vmatmul.mubr.bf16.vlgmr.msra.gmra.mrb[12].mxu1 %v819_v53 }
 0x709   :  { %v927_v0 = vpop.f32.mrb[12].mxu1 }
 0x70a   :  { %v928_v55 = vadd.f32 %v1014_v54, %v927_v0  ;;  %v1235_v56 = vpop.f32.mrb[13].mxu1 }
 0x70b   :  { %v930_v57 = vpop.f32.mrb[14].mxu1 }
 0x70c   :  { %933 = vst [vmem:[#allocation8] sm:$0xff] %v928_v55  ;;  %v1236_v58 = vpop.f32.mrb[15].mxu1 }
 0x70d   :  { %1380 = shalt.err (!%p1377_p0)
}
 0x70e   :  { %s1381_s4 = scalar_lea.hbm %s1592_s5, 128 }
 0x70f   :  { %p1382_p1 = scmp.ne.s32.totalorder %s1592_s5, %s1381_s4  ;;  %p1385_p2 = scmp.lt.u32.totalorder %s1381_s4, %s1592_s5 }
 0x711   :  { %p1387_p3 = pnand %p1385_p2, %p1382_p1 }
 0x713   :  { %1390 = shalt.err (!%p1387_p3)
}
 0x714   :  { %943 = dma.vmem_to_hbm [thread:$0]  %s941_s18, 128, %s1592_s5, [#allocation4]  }
 0x715   :  { %1395 = dma.done.wait [#allocation4], 128  }
 0x716   :  { %1396 = vsyncadd [#allocation4], 4294967168 }
 0x717   :  { %947 = vsyncpa [#allocation3], 1 }
 0x718   :  { %948 = vsyncpa [#allocation6], 1 }
 0x719   :  { %949 = vsyncpa [#allocation4], 1 }

// kernel: tpu_custom_call.1
= control target key start
LH: loop header
LB: loop body
LE: loop exit
PB: predicated region body
PF: predicated region fallthrough
CT: control target
= control target key end

     0   :  { %10 = vsyncpa [#allocation3], 0  ;;  %s1587_s0 = inlined_call_operand.hbm [shape: f32[8,32], index: 0, kind: input, shape index: {}]   ;;  %s1588_s1 = inlined_call_operand.hbm [shape: bf16[32,128], index: 1, kind: input, shape index: {}]   ;;  %s1589_s2 = inlined_call_operand.vmem [shape: f32[1,128], index: 2, kind: input, shape index: {}]   ;;  %s1590_s3 = inlined_call_operand.hbm [shape: bf16[7,128,128], index: 3, kind: input, shape index: {}]   ;;  %s1591_s4 = inlined_call_operand.vmem [shape: f32[7,1,128], index: 4, kind: input, shape index: {}]   ;;  %s1592_s5 = inlined_call_operand.hbm [shape: f32[8,128], index: 5, kind: output, shape index: {}]  }
   0x1   :  { %11 = vsyncpa [#allocation6], 0 }
   0x2   :  { %12 = vsyncpa [#allocation4], 0  ;;  %s1397_s18 = smov [#allocation5]   ;;  %s1303_s22 = scalar_lea.hbm %s1588_s1, 256 }
   0x3   :  { %s28_s19 = sshll.u32 %s1397_s18, 4  ;;  %p1304_p0 = scmp.ne.s32.totalorder %s1588_s1, %s1303_s22  ;;  %s29_s19 = int_to_ptr.vmem [resolvable:$true] %s28_s19 }
   0x4   :  { %p1307_p1 = scmp.lt.u32.totalorder %s1303_s22, %s1588_s1 }
   0x6   :  { %p1309_p2 = pnand %p1307_p1, %p1304_p0 }
   0x8   :  { %1312 = shalt.err (!%p1309_p2)
}
   0x9   :  { %s1313_s27 = scalar_lea.vmem %s29_s19, 256  ;;  %p1318_p4 = scmp.lt.s32.totalorder %s29_s19, %s29_s19 }
   0xa   :  { %p1314_p3 = scmp.ne.s32.totalorder %s29_s19, %s1313_s27  ;;  %p1319_p5 = scmp.lt.s32.totalorder %s1313_s27, %s1313_s27 }
   0xc   :  { %p1320_p6 = por %p1319_p5, %p1318_p4 }
   0xe   :  { %p1321_p7 = pnand %p1320_p6, %p1314_p3 }
  0x10   :  { %1324 = shalt.err (!%p1321_p7)
}
  0x11   :  { %s1398_s28 = smov 64   ;;  %s1399_s29 = smov 4  }
  0x12   :  { %34 = dma.hbm_to_vmem [thread:$0]  %s1588_s1, 256, %s29_s19, [#allocation6], %s1398_s28, %s1398_s28, %s1399_s29  }
  0x13   :  { %s1400_s7 = smov [#allocation2]   ;;  %s1401_s9 = smov [#allocation7]  }
  0x14   :  { %s19_s8 = sshll.u32 %s1400_s7, 4  ;;  %s42_s10 = sshll.u32 %s1401_s9, 4  ;;  %s20_s8 = int_to_ptr.vmem [resolvable:$true] %s19_s8  ;;  %s43_s10 = int_to_ptr.vmem [resolvable:$true] %s42_s10 }
  0x15   :  { %s1325_s13 = scalar_lea.hbm %s1587_s0, 128 }
  0x16   :  { %p1326_p8 = scmp.ne.s32.totalorder %s1587_s0, %s1325_s13  ;;  %p1329_p9 = scmp.lt.u32.totalorder %s1325_s13, %s1587_s0 }
  0x18   :  { %p1331_p10 = pnand %p1329_p9, %p1326_p8 }
  0x1a   :  { %1334 = shalt.err (!%p1331_p10)
}
  0x1b   :  { %s1335_s1 = scalar_lea.vmem %s20_s8, 128  ;;  %p1340_p12 = scmp.lt.s32.totalorder %s20_s8, %s20_s8 }
  0x1c   :  { %p1336_p11 = scmp.ne.s32.totalorder %s20_s8, %s1335_s1  ;;  %p1341_p13 = scmp.lt.s32.totalorder %s1335_s1, %s1335_s1 }
  0x1e   :  { %p1342_p0 = por %p1341_p13, %p1340_p12 }
  0x20   :  { %p1343_p1 = pnand %p1342_p0, %p1336_p11 }
  0x22   :  { %1346 = shalt.err (!%p1343_p1)
}
  0x23   :  { %22 = dma.hbm_to_vmem [thread:$0]  %s1587_s0, 128, %s20_s8, [#allocation3]  }
  0x24   :  { %s1347_s22 = scalar_lea.hbm %s1590_s3, 7168 }
  0x25   :  { %p1348_p2 = scmp.ne.s32.totalorder %s1590_s3, %s1347_s22  ;;  %p1351_p3 = scmp.lt.u32.totalorder %s1347_s22, %s1590_s3 }
  0x27   :  { %p1353_p4 = pnand %p1351_p3, %p1348_p2 }
  0x29   :  { %1356 = shalt.err (!%p1353_p4)
}
  0x2a   :  { %s1357_s27 = scalar_lea.vmem %s43_s10, 7168  ;;  %p1362_p6 = scmp.lt.s32.totalorder %s43_s10, %s43_s10 }
  0x2b   :  { %p1358_p5 = scmp.ne.s32.totalorder %s43_s10, %s1357_s27  ;;  %p1363_p7 = scmp.lt.s32.totalorder %s1357_s27, %s1357_s27 }
  0x2d   :  { %p1364_p8 = por %p1363_p7, %p1362_p6 }
  0x2f   :  { %p1365_p9 = pnand %p1364_p8, %p1358_p5 }
  0x31   :  { %1368 = shalt.err (!%p1365_p9)
}
  0x32   :  { %48 = dma.hbm_to_vmem [thread:$0]  %s1590_s3, 7168, %s43_s10, [#allocation6], %s1398_s28, %s1398_s28, %s1399_s29  }
  0x33   :  { %1391 = dma.done.wait [#allocation3], 128  }
  0x34   :  { %1392 = vsyncadd [#allocation3], 4294967168 }
  0x35   :  { %1393 = dma.done.wait [#allocation6], 7424  }
  0x36   :  { %1394 = vsyncadd [#allocation6], 4294959872  ;;  %v1402_v0 = vmov 0.0   ;;  %vm1403_vm0 = vmmov 0   ;;  %v1245_v1 = vld [vmem:[#allocation5] sm:$0xff]   ;;  %v1246_v2 = vld [vmem:[#allocation5 + $0x8] sm:$0xff]  }
  0x37   :  { %1089 = vmatprep.subr.bf16.mxu0 %v1402_v0  ;;  %1093 = vmatprep.mubr.msk.bf16.mxu0 %vm1403_vm0, %v1402_v0  ;;  %v61_v3 = vld [vmem:[#allocation2] sm:$0xff]  ;;  %v1247_v4 = vld [vmem:[#allocation7] sm:$0xff]   ;;  %vm86_vm1 = vcmask 261120   ;;  %v1249_v7 = vld [vmem:[#allocation7 + $0x10] sm:$0xff]   ;;  %s1404_s1 = smov [#allocation8]  }
  0x38   :  { %1097 = vmatprep.subr.bf16.mxu1 %v1402_v0  ;;  %1113 = vmatprep.mubr.msk.bf16.mxu1 %vm1403_vm0, %v1402_v0  ;;  %v62_v5 = vpack.c.bf16 %v61_v3, %v61_v3  ;;  %v1248_v6 = vld [vmem:[#allocation7 + $0x8] sm:$0xff]   ;;  %v1250_v8 = vld [vmem:[#allocation7 + $0x18] sm:$0xff]   ;;  %v1251_v9 = vld [vmem:[#allocation7 + $0x20] sm:$0xff]   ;;  %s940_s18 = sshll.u32 %s1404_s1, 4  ;;  %s941_s18 = int_to_ptr.vmem [resolvable:$true] %s940_s18 }
  0x39   :  { %1090 = vmatpush3.bf16.msra.mxu0 %v1245_v1  ;;  %1098 = vmatpush3.bf16.msra.mxu1 %v1247_v4  ;;  %v1252_v10 = vld [vmem:[#allocation7 + $0x28] sm:$0xff]   ;;  %v1253_v11 = vld [vmem:[#allocation7 + $0x30] sm:$0xff]   ;;  %v1254_v12 = vld [vmem:[#allocation7 + $0x38] sm:$0xff]   ;;  %s1369_s19 = scalar_lea.vmem %s941_s18, 128  ;;  %p1374_p11 = scmp.lt.s32.totalorder %s941_s18, %s941_s18 }
  0x3a   :  { %1091 = vmatprep.subr.bf16.mxu0 %v1402_v0  ;;  %1099 = vmatprep.subr.bf16.mxu1 %v1402_v0  ;;  %v1255_v13 = vld [vmem:[#allocation7 + $0x40] sm:$0xff]   ;;  %v1256_v14 = vld [vmem:[#allocation7 + $0x48] sm:$0xff]   ;;  %v1257_v15 = vld [vmem:[#allocation7 + $0x50] sm:$0xff]   ;;  %p1370_p10 = scmp.ne.s32.totalorder %s941_s18, %s1369_s19  ;;  %p1375_p12 = scmp.lt.s32.totalorder %s1369_s19, %s1369_s19 }
  0x3b   :  { %v1258_v16 = vld [vmem:[#allocation7 + $0x58] sm:$0xff]   ;;  %v1259_v17 = vld [vmem:[#allocation7 + $0x60] sm:$0xff]   ;;  %v1260_v18 = vld [vmem:[#allocation7 + $0x68] sm:$0xff]  }
  0x3c   :  { %v950_v19 = vld [vmem:[%s1589_s2] ss:$0 sm:$0xff]  ;;  %v1261_v27 = vld [vmem:[#allocation7 + $0x70] sm:$0xff]   ;;  %v1262_v28 = vld [vmem:[#allocation7 + $0x78] sm:$0xff]   ;;  %p1376_p13 = por %p1375_p12, %p1374_p11 }
  0x3d   :  { %1092 = vmatpush3.bf16.msra.mxu0 %v1246_v2  ;;  %1100 = vmatpush3.bf16.msra.mxu1 %v1248_v6  ;;  %v1263_v29 = vld [vmem:[#allocation7 + $0x80] sm:$0xff]   ;;  %v1264_v30 = vld [vmem:[#allocation7 + $0x88] sm:$0xff]   ;;  %v1265_v31 = vld [vmem:[#allocation7 + $0x90] sm:$0xff]  }
  0x3e   :  { %1117 = vmatprep.subr.bf16.mxu0 %v1402_v0  ;;  %1101 = vmatprep.subr.bf16.mxu1 %v1402_v0  ;;  %v1266_v32 = vld [vmem:[#allocation7 + $0x98] sm:$0xff]   ;;  %v1267_v33 = vld [vmem:[#allocation7 + $0xa0] sm:$0xff]   ;;  %v1268_v34 = vld [vmem:[#allocation7 + $0xa8] sm:$0xff]   ;;  %p1377_p0 = pnand %p1376_p13, %p1370_p10 }
  0x3f   :  { %v954_v35 = vld [vmem:[%s1591_s4] ss:$0 sm:$0xff]  ;;  %v1269_v43 = vld [vmem:[#allocation7 + $0xb0] sm:$0xff]   ;;  %v1270_v44 = vld [vmem:[#allocation7 + $0xb8] sm:$0xff]  }
  0x40   :  { %1094 = vmatmul.mubr.msk.bf16.vlgmr.msra.gmra.mrb[0].mxu0 %vm86_vm1, %v62_v5  ;;  %v1271_v45 = vld [vmem:[#allocation7 + $0xc0] sm:$0xff]   ;;  %v1272_v46 = vld [vmem:[#allocation7 + $0xc8] sm:$0xff]   ;;  %v1273_v47 = vld [vmem:[#allocation7 + $0xd0] sm:$0xff]  }
  0x41   :  { %1133 = vmatprep.mubr.msk.bf16.mxu0 %vm1403_vm0, %v1402_v0  ;;  %1102 = vmatpush3.bf16.msra.mxu1 %v1249_v7  ;;  %v1274_v48 = vld [vmem:[#allocation7 + $0xd8] sm:$0xff]   ;;  %v1275_v49 = vld [vmem:[#allocation7 + $0xe0] sm:$0xff]   ;;  %v1276_v50 = vld [vmem:[#allocation7 + $0xe8] sm:$0xff]  }
  0x42   :  { %1103 = vmatprep.subr.bf16.mxu1 %v1402_v0  ;;  %1118 = vmatpush3.bf16.msra.mxu0 %v1255_v13  ;;  %v964_v51 = vld [vmem:[%s1591_s4 + $0x1] ss:$0 sm:$0xff]  ;;  %v1277_v59 = vld [vmem:[#allocation7 + $0xf0] sm:$0xff]   ;;  %v1278_v60 = vld [vmem:[#allocation7 + $0xf8] sm:$0xff]  }
  0x43   :  { %1119 = vmatprep.subr.bf16.mxu0 %v1402_v0  ;;  %v1279_v61 = vld [vmem:[#allocation7 + $0x100] sm:$0xff]   ;;  %v1280_v62 = vld [vmem:[#allocation7 + $0x108] sm:$0xff]   ;;  %v1281_v63 = vld [vmem:[#allocation7 + $0x110] sm:$0xff]  }
  0x44   :  { %v1282_v1 = vld [vmem:[#allocation7 + $0x118] sm:$0xff]   ;;  %v1283_v2 = vld [vmem:[#allocation7 + $0x120] sm:$0xff]   ;;  %v1284_v3 = vld [vmem:[#allocation7 + $0x128] sm:$0xff]  }
  0x45   :  { %1104 = vmatpush3.bf16.msra.mxu1 %v1250_v8  ;;  %v974_v4 = vld [vmem:[%s1591_s4 + $0x2] ss:$0 sm:$0xff]  ;;  %v1286_v13 = vld [vmem:[#allocation7 + $0x138] sm:$0xff]  }
  0x46   :  { %1105 = vmatprep.subr.bf16.mxu1 %v1402_v0  ;;  %1120 = vmatpush3.bf16.msra.mxu0 %v1256_v14  ;;  %v1287_v14 = vld [vmem:[#allocation7 + $0x140] sm:$0xff]  }
  0x47   :  { %1121 = vmatprep.subr.bf16.mxu0 %v1402_v0 }
  0x49   :  { %1106 = vmatpush3.bf16.msra.mxu1 %v1251_v9 }
  0x4a   :  { %1107 = vmatprep.subr.bf16.mxu1 %v1402_v0  ;;  %1122 = vmatpush3.bf16.msra.mxu0 %v1257_v15  ;;  %v1288_v15 = vld [vmem:[#allocation7 + $0x148] sm:$0xff]  }
  0x4b   :  { %1123 = vmatprep.subr.bf16.mxu0 %v1402_v0 }
  0x4d   :  { %1108 = vmatpush3.bf16.msra.mxu1 %v1252_v10 }
  0x4e   :  { %1109 = vmatprep.subr.bf16.mxu1 %v1402_v0  ;;  %1124 = vmatpush3.bf16.msra.mxu0 %v1258_v16  ;;  %v1289_v16 = vld [vmem:[#allocation7 + $0x150] sm:$0xff]  }
  0x4f   :  { %1125 = vmatprep.subr.bf16.mxu0 %v1402_v0 }
  0x51   :  { %1110 = vmatpush3.bf16.msra.mxu1 %v1253_v11 }
  0x52   :  { %1111 = vmatprep.subr.bf16.mxu1 %v1402_v0  ;;  %1126 = vmatpush3.bf16.msra.mxu0 %v1259_v17  ;;  %v1290_v17 = vld [vmem:[#allocation7 + $0x158] sm:$0xff]  }
  0x53   :  { %1127 = vmatprep.subr.bf16.mxu0 %v1402_v0 }
  0x55   :  { %1112 = vmatpush3.bf16.msra.mxu1 %v1254_v12  ;;  %v1285_v12 = vld [vmem:[#allocation7 + $0x130] sm:$0xff]  }
  0x56   :  { %1137 = vmatprep.subr.bf16.mxu1 %v1402_v0  ;;  %1128 = vmatpush3.bf16.msra.mxu0 %v1260_v18  ;;  %v1291_v18 = vld [vmem:[#allocation7 + $0x160] sm:$0xff]  }
  0x57   :  { %1129 = vmatprep.subr.bf16.mxu0 %v1402_v0 }
  0x5a   :  { %1130 = vmatpush3.bf16.msra.mxu0 %v1261_v27 }
  0x5b   :  { %1131 = vmatprep.subr.bf16.mxu0 %v1402_v0 }
  0x5e   :  { %1132 = vmatpush3.bf16.msra.mxu0 %v1262_v28  ;;  %v1293_v28 = vld [vmem:[#allocation7 + $0x170] sm:$0xff]  }
  0x5f   :  { %1157 = vmatprep.subr.bf16.mxu0 %v1402_v0 }
 0x113   :  { %v124_v20 = vpop.f32.mrb[0].mxu0 }
 0x114   :  { %v125_v21 = vadd.f32 %v950_v19, %v124_v20  ;;  %v1095_v22 = vpop.f32.mrb[1].mxu0  ;;  %v1292_v19 = vld [vmem:[#allocation7 + $0x168] sm:$0xff]  }
 0x115   :  { %v127_v23 = vpop.f32.mrb[2].mxu0  ;;  %v984_v20 = vld [vmem:[%s1591_s4 + $0x3] ss:$0 sm:$0xff] }
 0x116   :  { %v130_v24 = vmax.f32 %v125_v21, 0.0  ;;  %v1096_v25 = vpop.f32.mrb[3].mxu0 }
 0x118   :  { %v131_v26 = vpack.c.bf16 %v130_v24, %v130_v24 }
 0x11a   :  { %1114 = vmatmul.mubr.bf16.vlgmr.msra.gmra.mrb[0].mxu1 %v131_v26 }
 0x11b   :  { %1153 = vmatprep.mubr.msk.bf16.mxu1 %vm1403_vm0, %v1402_v0  ;;  %1138 = vmatpush3.bf16.msra.mxu1 %v1263_v29  ;;  %v1294_v29 = vld [vmem:[#allocation7 + $0x178] sm:$0xff]  }
 0x11c   :  { %1139 = vmatprep.subr.bf16.mxu1 %v1402_v0 }
 0x11f   :  { %1140 = vmatpush3.bf16.msra.mxu1 %v1264_v30  ;;  %v1295_v30 = vld [vmem:[#allocation7 + $0x180] sm:$0xff]  }
 0x120   :  { %1141 = vmatprep.subr.bf16.mxu1 %v1402_v0 }
 0x123   :  { %1142 = vmatpush3.bf16.msra.mxu1 %v1265_v31  ;;  %v1296_v31 = vld [vmem:[#allocation7 + $0x188] sm:$0xff]  }
 0x124   :  { %1143 = vmatprep.subr.bf16.mxu1 %v1402_v0 }
 0x127   :  { %1144 = vmatpush3.bf16.msra.mxu1 %v1266_v32  ;;  %v1297_v32 = vld [vmem:[#allocation7 + $0x190] sm:$0xff]  }
 0x128   :  { %1145 = vmatprep.subr.bf16.mxu1 %v1402_v0 }
 0x12b   :  { %1146 = vmatpush3.bf16.msra.mxu1 %v1267_v33  ;;  %v1298_v33 = vld [vmem:[#allocation7 + $0x198] sm:$0xff]  }
 0x12c   :  { %1147 = vmatprep.subr.bf16.mxu1 %v1402_v0 }
 0x12f   :  { %1148 = vmatpush3.bf16.msra.mxu1 %v1268_v34  ;;  %v1299_v34 = vld [vmem:[#allocation7 + $0x1a0] sm:$0xff]  }
 0x130   :  { %1149 = vmatprep.subr.bf16.mxu1 %v1402_v0 }
 0x133   :  { %1150 = vmatpush3.bf16.msra.mxu1 %v1269_v43 }
 0x134   :  { %1151 = vmatprep.subr.bf16.mxu1 %v1402_v0 }
 0x137   :  { %1152 = vmatpush3.bf16.msra.mxu1 %v1270_v44  ;;  %v1301_v44 = vld [vmem:[#allocation7 + $0x1b0] sm:$0xff]  }
 0x138   :  { %1177 = vmatprep.subr.bf16.mxu1 %v1402_v0 }
 0x1ed   :  { %v237_v36 = vpop.f32.mrb[0].mxu1 }
 0x1ee   :  { %v238_v37 = vadd.f32 %v954_v35, %v237_v36  ;;  %v1115_v38 = vpop.f32.mrb[1].mxu1  ;;  %v1300_v35 = vld [vmem:[#allocation7 + $0x1a8] sm:$0xff]  }
 0x1ef   :  { %v240_v39 = vpop.f32.mrb[2].mxu1  ;;  %v994_v36 = vld [vmem:[%s1591_s4 + $0x4] ss:$0 sm:$0xff] }
 0x1f0   :  { %v243_v40 = vmax.f32 %v238_v37, 0.0  ;;  %v1116_v41 = vpop.f32.mrb[3].mxu1 }
 0x1f2   :  { %v244_v42 = vpack.c.bf16 %v243_v40, %v243_v40 }
 0x1f4   :  { %1134 = vmatmul.mubr.bf16.vlgmr.msra.gmra.mrb[4].mxu0 %v244_v42 }
 0x1f5   :  { %1173 = vmatprep.mubr.msk.bf16.mxu0 %vm1403_vm0, %v1402_v0  ;;  %1158 = vmatpush3.bf16.msra.mxu0 %v1271_v45  ;;  %v1302_v45 = vld [vmem:[#allocation7 + $0x1b8] sm:$0xff]  }
 0x1f6   :  { %1159 = vmatprep.subr.bf16.mxu0 %v1402_v0 }
 0x1f9   :  { %1160 = vmatpush3.bf16.msra.mxu0 %v1272_v46  ;;  %v1004_v46 = vld [vmem:[%s1591_s4 + $0x5] ss:$0 sm:$0xff] }
 0x1fa   :  { %1161 = vmatprep.subr.bf16.mxu0 %v1402_v0 }
 0x1fd   :  { %1162 = vmatpush3.bf16.msra.mxu0 %v1273_v47 }
 0x1fe   :  { %1163 = vmatprep.subr.bf16.mxu0 %v1402_v0 }
 0x201   :  { %1164 = vmatpush3.bf16.msra.mxu0 %v1274_v48 }
 0x202   :  { %1165 = vmatprep.subr.bf16.mxu0 %v1402_v0 }
 0x205   :  { %1166 = vmatpush3.bf16.msra.mxu0 %v1275_v49 }
 0x206   :  { %1167 = vmatprep.subr.bf16.mxu0 %v1402_v0 }
 0x209   :  { %1168 = vmatpush3.bf16.msra.mxu0 %v1276_v50 }
 0x20a   :  { %1169 = vmatprep.subr.bf16.mxu0 %v1402_v0 }
 0x20d   :  { %1170 = vmatpush3.bf16.msra.mxu0 %v1277_v59 }
 0x20e   :  { %1171 = vmatprep.subr.bf16.mxu0 %v1402_v0 }
 0x211   :  { %1172 = vmatpush3.bf16.msra.mxu0 %v1278_v60 }
 0x212   :  { %1197 = vmatprep.subr.bf16.mxu0 %v1402_v0 }
 0x2c7   :  { %v352_v52 = vpop.f32.mrb[4].mxu0 }
 0x2c8   :  { %v353_v53 = vadd.f32 %v964_v51, %v352_v52  ;;  %v1135_v54 = vpop.f32.mrb[5].mxu0 }
 0x2c9   :  { %v355_v55 = vpop.f32.mrb[6].mxu0  ;;  %v1014_v54 = vld [vmem:[%s1591_s4 + $0x6] ss:$0 sm:$0xff] }
 0x2ca   :  { %v358_v56 = vmax.f32 %v353_v53, 0.0  ;;  %v1136_v57 = vpop.f32.mrb[7].mxu0 }
 0x2cc   :  { %v359_v58 = vpack.c.bf16 %v358_v56, %v358_v56 }
 0x2ce   :  { %1154 = vmatmul.mubr.bf16.vlgmr.msra.gmra.mrb[4].mxu1 %v359_v58 }
 0x2cf   :  { %1193 = vmatprep.mubr.msk.bf16.mxu1 %vm1403_vm0, %v1402_v0  ;;  %1178 = vmatpush3.bf16.msra.mxu1 %v1279_v61 }
 0x2d0   :  { %1179 = vmatprep.subr.bf16.mxu1 %v1402_v0 }
 0x2d3   :  { %1180 = vmatpush3.bf16.msra.mxu1 %v1280_v62 }
 0x2d4   :  { %1181 = vmatprep.subr.bf16.mxu1 %v1402_v0 }
 0x2d7   :  { %1182 = vmatpush3.bf16.msra.mxu1 %v1281_v63 }
 0x2d8   :  { %1183 = vmatprep.subr.bf16.mxu1 %v1402_v0 }
 0x2db   :  { %1184 = vmatpush3.bf16.msra.mxu1 %v1282_v1 }
 0x2dc   :  { %1185 = vmatprep.subr.bf16.mxu1 %v1402_v0 }
 0x2df   :  { %1186 = vmatpush3.bf16.msra.mxu1 %v1283_v2 }
 0x2e0   :  { %1187 = vmatprep.subr.bf16.mxu1 %v1402_v0 }
 0x2e3   :  { %1188 = vmatpush3.bf16.msra.mxu1 %v1284_v3 }
 0x2e4   :  { %1189 = vmatprep.subr.bf16.mxu1 %v1402_v0 }
 0x2e7   :  { %1190 = vmatpush3.bf16.msra.mxu1 %v1285_v12 }
 0x2e8   :  { %1191 = vmatprep.subr.bf16.mxu1 %v1402_v0 }
 0x2eb   :  { %1192 = vmatpush3.bf16.msra.mxu1 %v1286_v13 }
 0x2ec   :  { %1217 = vmatprep.subr.bf16.mxu1 %v1402_v0 }
 0x3a1   :  { %v467_v5 = vpop.f32.mrb[4].mxu1 }
 0x3a2   :  { %v468_v6 = vadd.f32 %v974_v4, %v467_v5  ;;  %v1155_v7 = vpop.f32.mrb[5].mxu1 }
 0x3a3   :  { %v470_v8 = vpop.f32.mrb[6].mxu1 }
 0x3a4   :  { %v473_v9 = vmax.f32 %v468_v6, 0.0  ;;  %v1156_v10 = vpop.f32.mrb[7].mxu1 }
 0x3a6   :  { %v474_v11 = vpack.c.bf16 %v473_v9, %v473_v9 }
 0x3a8   :  { %1174 = vmatmul.mubr.bf16.vlgmr.msra.gmra.mrb[8].mxu0 %v474_v11 }
 0x3a9   :  { %1213 = vmatprep.mubr.msk.bf16.mxu0 %vm1403_vm0, %v1402_v0  ;;  %1198 = vmatpush3.bf16.msra.mxu0 %v1287_v14 }
 0x3aa   :  { %1199 = vmatprep.subr.bf16.mxu0 %v1402_v0 }
 0x3ad   :  { %1200 = vmatpush3.bf16.msra.mxu0 %v1288_v15 }
 0x3ae   :  { %1201 = vmatprep.subr.bf16.mxu0 %v1402_v0 }
 0x3b1   :  { %1202 = vmatpush3.bf16.msra.mxu0 %v1289_v16 }
 0x3b2   :  { %1203 = vmatprep.subr.bf16.mxu0 %v1402_v0 }
 0x3b5   :  { %1204 = vmatpush3.bf16.msra.mxu0 %v1290_v17 }
 0x3b6   :  { %1205 = vmatprep.subr.bf16.mxu0 %v1402_v0 }
 0x3b9   :  { %1206 = vmatpush3.bf16.msra.mxu0 %v1291_v18 }
 0x3ba   :  { %1207 = vmatprep.subr.bf16.mxu0 %v1402_v0 }
 0x3bd   :  { %1208 = vmatpush3.bf16.msra.mxu0 %v1292_v19 }
 0x3be   :  { %1209 = vmatprep.subr.bf16.mxu0 %v1402_v0 }
 0x3c1   :  { %1210 = vmatpush3.bf16.msra.mxu0 %v1293_v28 }
 0x3c2   :  { %1211 = vmatprep.subr.bf16.mxu0 %v1402_v0 }
 0x3c5   :  { %1212 = vmatpush3.bf16.msra.mxu0 %v1294_v29 }
 0x47b   :  { %v582_v21 = vpop.f32.mrb[8].mxu0 }
 0x47c   :  { %v583_v22 = vadd.f32 %v984_v20, %v582_v21  ;;  %v1175_v23 = vpop.f32.mrb[9].mxu0 }
 0x47d   :  { %v585_v24 = vpop.f32.mrb[10].mxu0 }
 0x47e   :  { %v588_v25 = vmax.f32 %v583_v22, 0.0  ;;  %v1176_v26 = vpop.f32.mrb[11].mxu0 }
 0x480   :  { %v589_v27 = vpack.c.bf16 %v588_v25, %v588_v25 }
 0x482   :  { %1194 = vmatmul.mubr.bf16.vlgmr.msra.gmra.mrb[8].mxu1 %v589_v27 }
 0x483   :  { %1233 = vmatprep.mubr.msk.bf16.mxu1 %vm1403_vm0, %v1402_v0  ;;  %1218 = vmatpush3.bf16.msra.mxu1 %v1295_v30 }
 0x484   :  { %1219 = vmatprep.subr.bf16.mxu1 %v1402_v0 }
 0x487   :  { %1220 = vmatpush3.bf16.msra.mxu1 %v1296_v31 }
 0x488   :  { %1221 = vmatprep.subr.bf16.mxu1 %v1402_v0 }
 0x48b   :  { %1222 = vmatpush3.bf16.msra.mxu1 %v1297_v32 }
 0x48c   :  { %1223 = vmatprep.subr.bf16.mxu1 %v1402_v0 }
 0x48f   :  { %1224 = vmatpush3.bf16.msra.mxu1 %v1298_v33 }
 0x490   :  { %1225 = vmatprep.subr.bf16.mxu1 %v1402_v0 }
 0x493   :  { %1226 = vmatpush3.bf16.msra.mxu1 %v1299_v34 }
 0x494   :  { %1227 = vmatprep.subr.bf16.mxu1 %v1402_v0 }
 0x497   :  { %1228 = vmatpush3.bf16.msra.mxu1 %v1300_v35 }
 0x498   :  { %1229 = vmatprep.subr.bf16.mxu1 %v1402_v0 }
 0x49b   :  { %1230 = vmatpush3.bf16.msra.mxu1 %v1301_v44 }
 0x49c   :  { %1231 = vmatprep.subr.bf16.mxu1 %v1402_v0 }
 0x49f   :  { %1232 = vmatpush3.bf16.msra.mxu1 %v1302_v45 }
 0x555   :  { %v697_v37 = vpop.f32.mrb[8].mxu1 }
 0x556   :  { %v698_v38 = vadd.f32 %v994_v36, %v697_v37  ;;  %v1195_v39 = vpop.f32.mrb[9].mxu1 }
 0x557   :  { %v700_v40 = vpop.f32.mrb[10].mxu1 }
 0x558   :  { %v703_v41 = vmax.f32 %v698_v38, 0.0  ;;  %v1196_v42 = vpop.f32.mrb[11].mxu1 }
 0x55a   :  { %v704_v43 = vpack.c.bf16 %v703_v41, %v703_v41 }
 0x55c   :  { %1214 = vmatmul.mubr.bf16.vlgmr.msra.gmra.mrb[12].mxu0 %v704_v43 }
 0x62f   :  { %v812_v47 = vpop.f32.mrb[12].mxu0 }
 0x630   :  { %v813_v48 = vadd.f32 %v1004_v46, %v812_v47  ;;  %v1215_v49 = vpop.f32.mrb[13].mxu0 }
 0x631   :  { %v815_v50 = vpop.f32.mrb[14].mxu0 }
 0x632   :  { %v818_v51 = vmax.f32 %v813_v48, 0.0  ;;  %v1216_v52 = vpop.f32.mrb[15].mxu0 }
 0x634   :  { %v819_v53 = vpack.c.bf16 %v818_v51, %v818_v51 }
 0x636   :  { %1234 = vmatmul.mubr.bf16.vlgmr.msra.gmra.mrb[12].mxu1 %v819_v53 }
 0x709   :  { %v927_v0 = vpop.f32.mrb[12].mxu1 }
 0x70a   :  { %v928_v55 = vadd.f32 %v1014_v54, %v927_v0  ;;  %v1235_v56 = vpop.f32.mrb[13].mxu1 }
 0x70b   :  { %v930_v57 = vpop.f32.mrb[14].mxu1 }
 0x70c   :  { %933 = vst [vmem:[#allocation8] sm:$0xff] %v928_v55  ;;  %v1236_v58 = vpop.f32.mrb[15].mxu1 }
 0x70d   :  { %1380 = shalt.err (!%p1377_p0)
}
 0x70e   :  { %s1381_s4 = scalar_lea.hbm %s1592_s5, 128 }
 0x70f   :  { %p1382_p1 = scmp.ne.s32.totalorder %s1592_s5, %s1381_s4  ;;  %p1385_p2 = scmp.lt.u32.totalorder %s1381_s4, %s1592_s5 }
 0x711   :  { %p1387_p3 = pnand %p1385_p2, %p1382_p1 }
 0x713   :  { %1390 = shalt.err (!%p1387_p3)
}
 0x714   :  { %943 = dma.vmem_to_hbm [thread:$0]  %s941_s18, 128, %s1592_s5, [#allocation4]  }
 0x715   :  { %1395 = dma.done.wait [#allocation4], 128  }
 0x716   :  { %1396 = vsyncadd [#allocation4], 4294967168 }
 0x717   :  { %947 = vsyncpa [#allocation3], 1 }
 0x718   :  { %948 = vsyncpa [#allocation6], 1 }
 0x719   :  { %949 = vsyncpa [#allocation4], 1 }

</bundles_post_ra>
